<compile_context>
chip_gen: v6e
topology: v6e:2x2x1
jax: 0.10.0
libtpu: 0.0.40
codegen_flags: <defaults>
</compile_context>

<pallas_src>
import functools
import math

import jax
import jax.numpy as jnp
from jax.experimental import pallas as pl
from jax.experimental.pallas import tpu as pltpu


_SCALE_CLAMP = math.log(1000.0 / 16.0)   # SparseRCNN box-delta scale clamp


# ----------------------------------------------------------------- utilities

def _round_up(x, m):
    return ((x + m - 1) // m) * m


def _pick_spatial_tile(S, max_tile=2048):
    """Spatial tile: multiple of 8, capped so the (ts, CPP) bf16 input block
    plus double-buffering stays far under the v7x scoped-VMEM limit."""
    return min(_round_up(S, 8), max_tile)


# -------------------------------------------- kernel 1: patchify "backbone"
# Folded pixel-normalization + stride-P patchify conv (as matmul) + ReLU
# + per-frame spatial mean (ROI-feature stand-in).  Only the mean is written
# back to HBM (the full feature map was dead in the forward).
#   patches : (T, S_pad, CPP) bf16     S = Hp*Wp, CPP = C*P*P
#   w_fold  : (CPP, D)        bf16     (pixel mean/std folded in)
#   b_fold  : (1, D)          f32
#   fmean   : (T, 1, D)       f32      per-frame spatial mean over valid rows
def _patchify_kernel(p_ref, w_ref, b_ref, fmean_ref, acc_ref,
                     *, inv_s, s_valid, ts, need_mask):
    s = pl.program_id(1)

    @pl.when(s == 0)
    def _():
        acc_ref[...] = jnp.zeros_like(acc_ref)

    x = p_ref[0]                                                  # (ts, CPP) bf16
    y = jnp.dot(x, w_ref[...], preferred_element_type=jnp.float32)
    y = jnp.maximum(y + b_ref[...], 0.0)                          # (ts, D) f32

    if need_mask:   # static: only emitted when S was padded to a tile multiple
        row = s * ts + jax.lax.broadcasted_iota(jnp.int32, (ts, 1), 0)
        y = jnp.where(row < s_valid, y, 0.0)

    acc_ref[...] += jnp.sum(y, axis=0, keepdims=True)

    @pl.when(s == pl.num_programs(1) - 1)
    def _():
        fmean_ref[0] = acc_ref[...] * inv_s


def patchify_backbone(patches_bf16, w_fold_bf16, b_fold, *, s_valid, spatial_tile):
    T, S_pad, CPP = patches_bf16.shape
    D = w_fold_bf16.shape[1]
    ts = spatial_tile
    kernel = functools.partial(_patchify_kernel,
                               inv_s=1.0 / float(s_valid),
                               s_valid=s_valid, ts=ts,
                               need_mask=(S_pad != s_valid))
    return pl.pallas_call(
        kernel,
        out_shape=jax.ShapeDtypeStruct((T, 1, D), jnp.float32),
        grid=(T, S_pad // ts),
        in_specs=[pl.BlockSpec((1, ts, CPP), lambda t, s: (t, s, 0)),
                  pl.BlockSpec((CPP, D), lambda t, s: (0, 0)),
                  pl.BlockSpec((1, D), lambda t, s: (0, 0))],
        out_specs=pl.BlockSpec((1, 1, D), lambda t, s: (t, 0, 0)),
        scratch_shapes=[pltpu.VMEM((1, D), jnp.float32)],
        compiler_params=pltpu.CompilerParams(
            dimension_semantics=("parallel", "arbitrary")),
    )(patches_bf16, w_fold_bf16, b_fold)


# ------------------------------------------ kernel 2: fused DynamicHead stand-in
# One pallas_call over grid=(T, num_heads): frames are parallel (2 TCs on v7x),
# heads are the inner state-carrying axis.  Per (frame, head) step:
#   box-emb (VPU FMAs) -> fuse -> fused qkv matmul -> per-frame self-attention
#   -> FFN -> combined lane-dense cls+reg matmul -> box deltas; obj/box state
#   lives in VMEM scratch.  Only the last head's outputs hit HBM.
def _head_kernel(obj0_ref, fm_ref, box0_ref,
                 wbox_ref, bbox_ref, wqkv_ref, bqkv_ref,
                 wf1_ref, bf1_ref, wf2_ref, bf2_ref,
                 wcr_ref, bcr_ref,
                 logits_ref, boxes_ref, scores_ref,
                 obj_sc, box_sc, *, Np, D, K):
    h = pl.program_id(1)
    nh = pl.num_programs(1)
    bf16 = jnp.bfloat16

    @pl.when(h == 0)
    def _():
        obj_sc[...] = obj0_ref[...]
        box_sc[...] = box0_ref[...]

    obj = obj_sc[...]                                             # (Np, D) f32
    boxes = box_sc[...]                                           # (Np, 4) cxcywh

    # box embedding: contraction depth 4 -> 4 VPU broadcast FMAs, not an MXU push
    wb = wbox_ref[0]                                              # (4, D) f32
    box_emb = (boxes[:, 0:1] * wb[0:1, :] + boxes[:, 1:2] * wb[1:2, :]
               + boxes[:, 2:3] * wb[2:3, :] + boxes[:, 3:4] * wb[3:4, :]
               + bbox_ref[0])                                     # (Np, D)

    fused = obj + fm_ref[0] + box_emb                             # (Np, D) f32

    # fused q/k/v projection (1/sqrt(D) scale folded into the q weights);
    # bf16 MXU operands, f32 accumulation.
    qkv = jnp.dot(fused.astype(bf16), wqkv_ref[0],
                  preferred_element_type=jnp.float32) + bqkv_ref[0]
    q = qkv[:, 0:D]
    k = qkv[:, D:2 * D]
    v = qkv[:, 2 * D:3 * D]

    # per-frame proposal self-attention (Np x Np); softmax kept in f32.
    s = jax.lax.dot_general(q.astype(bf16), k.astype(bf16),
                            (((1,), (1,)), ((), ())),
                            preferred_element_type=jnp.float32)   # (Np, Np)
    s = s - jnp.max(s, axis=-1, keepdims=True)
    p = jnp.exp(s)
    p = p * pl.reciprocal(jnp.sum(p, axis=-1, keepdims=True), approx=True)
    att = jnp.dot(p.astype(bf16), v.astype(bf16),
                  preferred_element_type=jnp.float32)             # (Np, D)
    obj2 = fused + att

    # FFN (bf16 MXU operands, f32 residual path)
    f1 = jnp.maximum(jnp.dot(obj2.astype(bf16), wf1_ref[0],
                             preferred_element_type=jnp.float32) + bf1_ref[0], 0.0)
    f2 = jnp.dot(f1.astype(bf16), wf2_ref[0],
                 preferred_element_type=jnp.float32) + bf2_ref[0]
    obj_new = obj2 + f2
    obj_sc[...] = obj_new

    # combined lane-dense class + box-delta projection (cls in lanes [0,K),
    # deltas in lanes [K, K+4), zero padding to 128 lanes)
    y = jnp.dot(obj_new.astype(bf16), wcr_ref[0],
                preferred_element_type=jnp.float32) + bcr_ref[0]  # (Np, Ncr)

    # apply box deltas (SparseRCNN-style, clamp only the upper delta)
    d = y[:, K:K + 4]
    ctr = boxes[:, 0:2] + d[:, 0:2] * boxes[:, 2:4]
    wh = boxes[:, 2:4] * jnp.exp(jnp.minimum(d[:, 2:4], _SCALE_CLAMP))
    nb = jnp.concatenate([ctr, wh], axis=-1)
    box_sc[...] = nb

    # only the last head's logits / boxes / scores are consumed at inference
    @pl.when(h == nh - 1)
    def _():
        logits_ref[0] = y
        boxes_ref[0] = nb
        scores_ref[0] = jax.nn.sigmoid(y)


def dynamic_head(obj0, fmean, boxes0, hw, *, T, Np, D, K):
    nh = hw["w_qkv"].shape[0]
    Ncr = hw["w_clsreg"].shape[-1]
    kernel = functools.partial(_head_kernel, Np=Np, D=D, K=K)

    bf16 = jnp.bfloat16
    w_qkv = hw["w_qkv"].astype(bf16)          # big matmul weights -> bf16 once
    w_ffn1 = hw["w_ffn1"].astype(bf16)
    w_ffn2 = hw["w_ffn2"].astype(bf16)
    w_clsreg = hw["w_clsreg"].astype(bf16)

    def cspec(shape):            # constant across the grid
        return pl.BlockSpec(shape, lambda t, h: (0,) * len(shape))

    def hspec(shape):            # per-head weight slice (leading head axis)
        return pl.BlockSpec((1,) + shape, lambda t, h: (h, 0, 0))

    def tspec(shape):            # per-frame slice (leading frame axis)
        return pl.BlockSpec((1,) + shape, lambda t, h: (t, 0, 0))

    return pl.pallas_call(
        kernel,
        out_shape=(jax.ShapeDtypeStruct((T, Np, Ncr), jnp.float32),
                   jax.ShapeDtypeStruct((T, Np, 4), jnp.float32),
                   jax.ShapeDtypeStruct((T, Np, Ncr), jnp.float32)),
        grid=(T, nh),
        in_specs=[cspec((Np, D)), tspec((1, D)), cspec((Np, 4)),
                  hspec((4, D)), hspec((1, D)),
                  hspec((D, 3 * D)), hspec((1, 3 * D)),
                  hspec((D, 2 * D)), hspec((1, 2 * D)),
                  hspec((2 * D, D)), hspec((1, D)),
                  hspec((D, Ncr)), hspec((1, Ncr))],
        out_specs=(tspec((Np, Ncr)), tspec((Np, 4)), tspec((Np, Ncr))),
        scratch_shapes=[pltpu.VMEM((Np, D), jnp.float32),
                        pltpu.VMEM((Np, 4), jnp.float32)],
        compiler_params=pltpu.CompilerParams(
            dimension_semantics=("parallel", "arbitrary")),
    )(obj0, fmean, boxes0,
      hw["w_box"], hw["b_box"], w_qkv, hw["b_qkv"],
      w_ffn1, hw["b_ffn1"], w_ffn2, hw["b_ffn2"],
      w_clsreg, hw["b_clsreg"])


# ------------------------------------------------------------------ parameters

def init_params(key, *, D=128, K=4, Np=8, num_heads=2, C=3, P=4):
    keys = iter(jax.random.split(key, 64))

    def w(shape, scale=0.02):
        return jax.random.normal(next(keys), shape, jnp.float32) * scale

    Ncr = 128                                  # K cls + 4 reg + lane padding
    assert K + 4 <= Ncr

    w_qkv = w((num_heads, D, 3 * D))
    # fold the 1/sqrt(D) attention scale into the q projection (free at runtime)
    w_qkv = w_qkv.at[:, :, :D].multiply(1.0 / math.sqrt(D))

    w_clsreg = jnp.zeros((num_heads, D, Ncr), jnp.float32)
    w_clsreg = (w_clsreg.at[:, :, :K].set(w((num_heads, D, K)))
                         .at[:, :, K:K + 4].set(w((num_heads, D, 4))))

    return {
        "pixel_mean": jnp.array([123.675, 116.28, 103.53], jnp.float32),
        "pixel_std": jnp.array([58.395, 57.12, 57.375], jnp.float32),
        # backbone stand-in: stride-P patchify conv expressed as a matmul
        "w_patch": w((C * P * P, D)),
        "b_patch": jnp.zeros((D,), jnp.float32),
        # nn.Embedding(num_proposals, hidden_dim)
        "proposal_feat": w((Np, D), 1.0),
        "heads": {
            "w_box": w((num_heads, 4, D)),
            "b_box": jnp.zeros((num_heads, 1, D), jnp.float32),
            "w_qkv": w_qkv,
            "b_qkv": jnp.zeros((num_heads, 1, 3 * D), jnp.float32),
            "w_ffn1": w((num_heads, D, 2 * D)),
            "b_ffn1": jnp.zeros((num_heads, 1, 2 * D), jnp.float32),
            "w_ffn2": w((num_heads, 2 * D, D)),
            "b_ffn2": jnp.zeros((num_heads, 1, D), jnp.float32),
            "w_clsreg": w_clsreg,
            "b_clsreg": jnp.zeros((num_heads, 1, Ncr), jnp.float32),
        },
    }


# ------------------------------------------------------------------ forward

def e2evid_forward(params, images, *, num_proposals=8, num_classes=4,
                   patch=4, out_hw=None):
    """Inference-mode forward. images: (T, 3, H, W) float32 (NCHW, like PyTorch)."""
    T, C, H, W = images.shape
    D = params["proposal_feat"].shape[1]
    Np, K = num_proposals, num_classes
    P = patch
    if out_hw is None:
        out_hw = (H, W)

    # ---- preprocess_image folded into the backbone: (x - mean)/std is baked
    # algebraically into the patchify weights -> no separate normalize pass.
    inv_std = 1.0 / params["pixel_std"]                    # (C,)
    inv_rep = jnp.repeat(inv_std, P * P)                   # (C*P*P,)
    mean_rep = jnp.repeat(params["pixel_mean"], P * P)
    w_fold = params["w_patch"] * inv_rep[:, None]
    b_fold = (params["b_patch"] - (mean_rep * inv_rep) @ params["w_patch"]
              ).reshape(1, D)

    # ---- patch extraction (layout glue), done in bf16 to halve its HBM traffic
    Hp, Wp = H // P, W // P
    S = Hp * Wp
    patches = (images.astype(jnp.bfloat16)
               .reshape(T, C, Hp, P, Wp, P)
               .transpose(0, 2, 4, 1, 3, 5)
               .reshape(T, S, C * P * P))

    ts = _pick_spatial_tile(S)
    S_pad = _round_up(S, ts)
    if S_pad != S:
        patches = jnp.pad(patches, ((0, 0), (0, S_pad - S), (0, 0)))

    # bf16 MXU inputs, f32 accumulation; only the per-frame mean is produced.
    fmean = patchify_backbone(patches, w_fold.astype(jnp.bfloat16), b_fold,
                              s_valid=S, spatial_tile=ts)         # (T, 1, D)
    # TODO(synk): real build_backbone (ResNet+FPN) + per-proposal ROIAlign are
    # unavailable; the patchify conv + per-frame spatial mean stand in for them.

    # ---- proposals (images_xywh = [0,0,W,H], as in the reference forward)
    # TODO(synk): the synthetic head interprets boxes as (cx,cy,w,h); the real
    # DynamicHead's box-format handling is not available.
    boxes0 = jnp.broadcast_to(
        jnp.array([0.0, 0.0, float(W), float(H)], jnp.float32), (Np, 4))
    obj0 = params["proposal_feat"]                         # (Np, D), shared per frame

    # ---- DynamicHead stand-in: all refinement stages fused, frames parallel
    logits_p, boxes_pred, scores_p = dynamic_head(
        obj0, fmean, boxes0, params["heads"], T=T, Np=Np, D=D, K=K)

    output = {"pred_logits": logits_p[:, :, :K],           # (T, Np, K) last head
              "pred_boxes": boxes_pred}                    # (T, Np, 4) last head

    # ---- inference path (sigmoid already computed in-kernel); topk is glue.
    # TODO(synk): HungarianMatcher / SetCriterion (training path) not implemented.
    scores = scores_p[:, :, :K]                            # (T, Np, K)
    box_pred = output["pred_boxes"]                        # (T, Np, 4) cxcywh

    out_h, out_w = out_hw
    scale = jnp.array([out_w / float(W), out_h / float(H),
                       out_w / float(W), out_h / float(H)], jnp.float32)

    topk = min(100, Np * K)
    top_scores, top_idx = jax.lax.top_k(scores.reshape(T, Np * K), topk)
    labels = jnp.tile(jnp.arange(K, dtype=jnp.int32), Np)  # (Np*K,)
    top_labels = labels[top_idx]                           # (T, topk)

    xyxy = jnp.concatenate([box_pred[..., 0:2] - 0.5 * box_pred[..., 2:4],
                            box_pred[..., 0:2] + 0.5 * box_pred[..., 2:4]],
                           axis=-1)                        # (T, Np, 4)
    xyxy_rep = jnp.repeat(xyxy, K, axis=1)                 # (T, Np*K, 4)
    top_boxes = jnp.take_along_axis(
        xyxy_rep, top_idx[:, :, None], axis=1) * scale     # (T, topk, 4)

    results = []
    for i in range(T):
        results.append({"instances": {"pred_boxes": top_boxes[i],
                                      "scores": top_scores[i],
                                      "pred_classes": top_labels[i]}})
    return results


# ------------------------------------------------------------------ main

if __name__ == "__main__":
    key = jax.random.PRNGKey(0)
    k_img, k_par = jax.random.split(key)

    T, C, H, W = 2, 3, 32, 32          # 2 frames of one video, 32x32 RGB
    NUM_PROPOSALS, NUM_CLASSES, NUM_HEADS, HIDDEN = 8, 4, 2, 128

    images = jax.random.uniform(k_img, (T, C, H, W), jnp.float32) * 255.0
    params = init_params(k_par, D=HIDDEN, K=NUM_CLASSES, Np=NUM_PROPOSALS,
                         num_heads=NUM_HEADS, C=C, P=4)

    fwd = jax.jit(functools.partial(e2evid_forward,
                                    num_proposals=NUM_PROPOSALS,
                                    num_classes=NUM_CLASSES,
                                    patch=4,
                                    out_hw=(H, W)))
    results = fwd(params, images)

    for r in results:
        jax.block_until_ready(r["instances"]["scores"])
        jax.block_until_ready(r["instances"]["pred_boxes"])
        jax.block_until_ready(r["instances"]["pred_classes"])

    print("KERNEL_OK")
</pallas_src>

<mosaic_0001>
module attributes {stable_mosaic.version = 11 : i64} {
  func.func @_patchify_kernel(%arg0: i32, %arg1: i32, %arg2: memref<1x64x48xbf16, #tpu.memory_space<vmem>>, %arg3: memref<48x128xbf16, #tpu.memory_space<vmem>>, %arg4: memref<1x128xf32, #tpu.memory_space<vmem>>, %arg5: memref<1x1x128xf32, #tpu.memory_space<vmem>>, %arg6: memref<1x128xf32, #tpu.memory_space<vmem>>) attributes {dimension_semantics = [#tpu.dimension_semantics<parallel>, #tpu.dimension_semantics<arbitrary>], iteration_bounds = array<i64: 2, 1>, scalar_prefetch = 0 : i64, scratch_operands = 1 : i64, tpu.core_type = #tpu.core_type<tc>, window_params = [{transform_indices = @transform_0, window_bounds = array<i64: 1, 64, 48>}, {pipeline_mode = #tpu.pipeline_mode<synchronous>, transform_indices = @transform_1, window_bounds = array<i64: 48, 128>}, {pipeline_mode = #tpu.pipeline_mode<synchronous>, transform_indices = @transform_2, window_bounds = array<i64: 1, 128>}, {transform_indices = @transform_3, window_bounds = array<i64: 1, 1, 128>}]} {
    %c0_i32 = arith.constant 0 : i32
    %0 = arith.cmpi eq, %arg1, %c0_i32 : i32
    %1 = arith.extui %0 : i1 to i32
    %c0_i32_0 = arith.constant 0 : i32
    %2 = arith.cmpi ne, %1, %c0_i32_0 : i32
    scf.if %2 {
      %cst_15 = arith.constant 0.000000e+00 : f32
      %20 = vector.broadcast %cst_15 : f32 to vector<1x128xf32>
      %c0_16 = arith.constant 0 : index
      %c0_17 = arith.constant 0 : index
      %21 = vector.load %arg6[%c0_16, %c0_17] : memref<1x128xf32, #tpu.memory_space<vmem>>, vector<1x128xf32>
      tpu.vector_store %arg6[%c0_16, %c0_17], %20 {strides = array<i32>} : memref<1x128xf32, #tpu.memory_space<vmem>>, vector<1x128xf32>,
    } else {
    }
    %c0 = arith.constant 0 : index
    %c0_1 = arith.constant 0 : index
    %c0_2 = arith.constant 0 : index
    %3 = vector.load %arg2[%c0, %c0_1, %c0_2] : memref<1x64x48xbf16, #tpu.memory_space<vmem>>, vector<1x64x48xbf16>
    %4 = vector.shape_cast %3 : vector<1x64x48xbf16> to vector<64x48xbf16>
    %c0_3 = arith.constant 0 : index
    %c0_4 = arith.constant 0 : index
    %5 = vector.load %arg3[%c0_3, %c0_4] : memref<48x128xbf16, #tpu.memory_space<vmem>>, vector<48x128xbf16>
    %cst = arith.constant dense<0.000000e+00> : vector<64x128xf32>
    %6 = tpu.matmul %4, %5, %cst {dimension_numbers = #tpu.dot_dimension_numbers<[1], [0], [0], [1], [0, 0, 1, 1], [], []>} : vector<64x48xbf16>, vector<48x128xbf16>, vector<64x128xf32> -> vector<64x128xf32>
    %c0_5 = arith.constant 0 : index
    %c0_6 = arith.constant 0 : index
    %7 = vector.load %arg4[%c0_5, %c0_6] : memref<1x128xf32, #tpu.memory_space<vmem>>, vector<1x128xf32>
    %8 = vector.broadcast %7 : vector<1x128xf32> to vector<64x128xf32>
    %9 = arith.addf %6, %8 : vector<64x128xf32>
    %cst_7 = arith.constant 0.000000e+00 : f32
    %10 = vector.broadcast %cst_7 : f32 to vector<64x128xf32>
    %11 = arith.maximumf %9, %10 : vector<64x128xf32>
    %c0_8 = arith.constant 0 : index
    %c0_9 = arith.constant 0 : index
    %12 = vector.load %arg6[%c0_8, %c0_9] : memref<1x128xf32, #tpu.memory_space<vmem>>, vector<1x128xf32>
    %cst_10 = arith.constant dense<0.000000e+00> : vector<128xf32>
    %13 = vector.multi_reduction <add>, %11, %cst_10 [0] : vector<64x128xf32> to vector<128xf32>
    %14 = vector.shape_cast %13 : vector<128xf32> to vector<1x128xf32>
    %15 = arith.addf %12, %14 : vector<1x128xf32>
    %c0_11 = arith.constant 0 : index
    %c0_12 = arith.constant 0 : index
    %16 = vector.load %arg6[%c0_11, %c0_12] : memref<1x128xf32, #tpu.memory_space<vmem>>, vector<1x128xf32>
    tpu.vector_store %arg6[%c0_11, %c0_12], %15 {strides = array<i32>} : memref<1x128xf32, #tpu.memory_space<vmem>>, vector<1x128xf32>,
    %c0_i32_13 = arith.constant 0 : i32
    %17 = arith.cmpi eq, %arg1, %c0_i32_13 : i32
    %18 = arith.extui %17 : i1 to i32
    %c0_i32_14 = arith.constant 0 : i32
    %19 = arith.cmpi ne, %18, %c0_i32_14 : i32
    scf.if %19 {
      %c0_15 = arith.constant 0 : index
      %c0_16 = arith.constant 0 : index
      %20 = vector.load %arg6[%c0_15, %c0_16] : memref<1x128xf32, #tpu.memory_space<vmem>>, vector<1x128xf32>
      %cst_17 = arith.constant 1.562500e-02 : f32
      %21 = vector.broadcast %cst_17 : f32 to vector<1x128xf32>
      %22 = arith.mulf %20, %21 : vector<1x128xf32>
      %c0_18 = arith.constant 0 : index
      %c0_19 = arith.constant 0 : index
      %c0_20 = arith.constant 0 : index
      %23 = vector.load %arg5[%c0_18, %c0_19, %c0_20] : memref<1x1x128xf32, #tpu.memory_space<vmem>>, vector<1x1x128xf32>
      %24 = vector.shape_cast %23 : vector<1x1x128xf32> to vector<1x128xf32>
      %25 = vector.shape_cast %22 : vector<1x128xf32> to vector<1x1x128xf32>
      tpu.vector_store %arg5[%c0_18, %c0_19, %c0_20], %25 {strides = array<i32>} : memref<1x1x128xf32, #tpu.memory_space<vmem>>, vector<1x1x128xf32>,
    } else {
    }
    return
  }
  func.func @transform_0(%arg0: i32, %arg1: i32) -> (i32, i32, i32) {
    %c0_i32 = arith.constant 0 : i32
    %c0_i32_0 = arith.constant 0 : i32
    return %arg0, %arg1, %c0_i32 : i32, i32, i32
  }
  func.func @transform_1(%arg0: i32, %arg1: i32) -> (i32, i32) {
    %c0_i32 = arith.constant 0 : i32
    %c0_i32_0 = arith.constant 0 : i32
    %c0_i32_1 = arith.constant 0 : i32
    return %c0_i32, %c0_i32_0 : i32, i32
  }
  func.func @transform_2(%arg0: i32, %arg1: i32) -> (i32, i32) {
    %c0_i32 = arith.constant 0 : i32
    %c0_i32_0 = arith.constant 0 : i32
    %c0_i32_1 = arith.constant 0 : i32
    return %c0_i32, %c0_i32_0 : i32, i32
  }
  func.func @transform_3(%arg0: i32, %arg1: i32) -> (i32, i32, i32) {
    %c0_i32 = arith.constant 0 : i32
    %c0_i32_0 = arith.constant 0 : i32
    %c0_i32_1 = arith.constant 0 : i32
    return %arg0, %c0_i32, %c0_i32_0 : i32, i32, i32
  }
}

module attributes {stable_mosaic.version = 11 : i64} {
  func.func @_head_kernel(%arg0: i32, %arg1: i32, %arg2: memref<8x128xf32, #tpu.memory_space<vmem>>, %arg3: memref<1x1x128xf32, #tpu.memory_space<vmem>>, %arg4: memref<8x4xf32, #tpu.memory_space<vmem>>, %arg5: memref<1x4x128xf32, #tpu.memory_space<vmem>>, %arg6: memref<1x1x128xf32, #tpu.memory_space<vmem>>, %arg7: memref<1x128x384xbf16, #tpu.memory_space<vmem>>, %arg8: memref<1x1x384xf32, #tpu.memory_space<vmem>>, %arg9: memref<1x128x256xbf16, #tpu.memory_space<vmem>>, %arg10: memref<1x1x256xf32, #tpu.memory_space<vmem>>, %arg11: memref<1x256x128xbf16, #tpu.memory_space<vmem>>, %arg12: memref<1x1x128xf32, #tpu.memory_space<vmem>>, %arg13: memref<1x128x128xbf16, #tpu.memory_space<vmem>>, %arg14: memref<1x1x128xf32, #tpu.memory_space<vmem>>, %arg15: memref<1x8x128xf32, #tpu.memory_space<vmem>>, %arg16: memref<1x8x4xf32, #tpu.memory_space<vmem>>, %arg17: memref<1x8x128xf32, #tpu.memory_space<vmem>>, %arg18: memref<8x128xf32, #tpu.memory_space<vmem>>, %arg19: memref<8x4xf32, #tpu.memory_space<vmem>>) attributes {dimension_semantics = [#tpu.dimension_semantics<parallel>, #tpu.dimension_semantics<arbitrary>], iteration_bounds = array<i64: 2, 2>, scalar_prefetch = 0 : i64, scratch_operands = 2 : i64, tpu.core_type = #tpu.core_type<tc>, window_params = [{pipeline_mode = #tpu.pipeline_mode<synchronous>, transform_indices = @transform_0, window_bounds = array<i64: 8, 128>}, {transform_indices = @transform_1, window_bounds = array<i64: 1, 1, 128>}, {pipeline_mode = #tpu.pipeline_mode<synchronous>, transform_indices = @transform_2, window_bounds = array<i64: 8, 4>}, {transform_indices = @transform_3, window_bounds = array<i64: 1, 4, 128>}, {transform_indices = @transform_4, window_bounds = array<i64: 1, 1, 128>}, {transform_indices = @transform_5, window_bounds = array<i64: 1, 128, 384>}, {transform_indices = @transform_6, window_bounds = array<i64: 1, 1, 384>}, {transform_indices = @transform_7, window_bounds = array<i64: 1, 128, 256>}, {transform_indices = @transform_8, window_bounds = array<i64: 1, 1, 256>}, {transform_indices = @transform_9, window_bounds = array<i64: 1, 256, 128>}, {transform_indices = @transform_10, window_bounds = array<i64: 1, 1, 128>}, {transform_indices = @transform_11, window_bounds = array<i64: 1, 128, 128>}, {transform_indices = @transform_12, window_bounds = array<i64: 1, 1, 128>}, {transform_indices = @transform_13, window_bounds = array<i64: 1, 8, 128>}, {transform_indices = @transform_14, window_bounds = array<i64: 1, 8, 4>}, {transform_indices = @transform_15, window_bounds = array<i64: 1, 8, 128>}]} {
    %c0_i32 = arith.constant 0 : i32
    %0 = arith.cmpi eq, %arg1, %c0_i32 : i32
    %1 = arith.extui %0 : i1 to i32
    %c0_i32_0 = arith.constant 0 : i32
    %2 = arith.cmpi ne, %1, %c0_i32_0 : i32
    scf.if %2 {
      %c0_51 = arith.constant 0 : index
      %c0_52 = arith.constant 0 : index
      %112 = vector.load %arg2[%c0_51, %c0_52] : memref<8x128xf32, #tpu.memory_space<vmem>>, vector<8x128xf32>
      %c0_53 = arith.constant 0 : index
      %c0_54 = arith.constant 0 : index
      %113 = vector.load %arg18[%c0_53, %c0_54] : memref<8x128xf32, #tpu.memory_space<vmem>>, vector<8x128xf32>
      tpu.vector_store %arg18[%c0_53, %c0_54], %112 {strides = array<i32>} : memref<8x128xf32, #tpu.memory_space<vmem>>, vector<8x128xf32>,
      %c0_55 = arith.constant 0 : index
      %c0_56 = arith.constant 0 : index
      %114 = vector.load %arg4[%c0_55, %c0_56] : memref<8x4xf32, #tpu.memory_space<vmem>>, vector<8x4xf32>
      %c0_57 = arith.constant 0 : index
      %c0_58 = arith.constant 0 : index
      %115 = vector.load %arg19[%c0_57, %c0_58] : memref<8x4xf32, #tpu.memory_space<vmem>>, vector<8x4xf32>
      tpu.vector_store %arg19[%c0_57, %c0_58], %114 {strides = array<i32>} : memref<8x4xf32, #tpu.memory_space<vmem>>, vector<8x4xf32>,
    } else {
    }
    %c0 = arith.constant 0 : index
    %c0_1 = arith.constant 0 : index
    %3 = vector.load %arg18[%c0, %c0_1] : memref<8x128xf32, #tpu.memory_space<vmem>>, vector<8x128xf32>
    %c0_2 = arith.constant 0 : index
    %c0_3 = arith.constant 0 : index
    %4 = vector.load %arg19[%c0_2, %c0_3] : memref<8x4xf32, #tpu.memory_space<vmem>>, vector<8x4xf32>
    %c0_4 = arith.constant 0 : index
    %c0_5 = arith.constant 0 : index
    %c0_6 = arith.constant 0 : index
    %5 = vector.load %arg5[%c0_4, %c0_5, %c0_6] : memref<1x4x128xf32, #tpu.memory_space<vmem>>, vector<1x4x128xf32>
    %6 = vector.shape_cast %5 : vector<1x4x128xf32> to vector<4x128xf32>
    %7 = vector.extract_strided_slice %4 {offsets = [0, 0], sizes = [8, 1], strides = [1, 1]} : vector<8x4xf32> to vector<8x1xf32>
    %8 = vector.extract_strided_slice %6 {offsets = [0, 0], sizes = [1, 128], strides = [1, 1]} : vector<4x128xf32> to vector<1x128xf32>
    %9 = vector.broadcast %7 : vector<8x1xf32> to vector<8x128xf32>
    %10 = vector.broadcast %8 : vector<1x128xf32> to vector<8x128xf32>
    %11 = arith.mulf %9, %10 : vector<8x128xf32>
    %12 = vector.extract_strided_slice %4 {offsets = [0, 1], sizes = [8, 1], strides = [1, 1]} : vector<8x4xf32> to vector<8x1xf32>
    %13 = vector.extract_strided_slice %6 {offsets = [1, 0], sizes = [1, 128], strides = [1, 1]} : vector<4x128xf32> to vector<1x128xf32>
    %14 = vector.broadcast %12 : vector<8x1xf32> to vector<8x128xf32>
    %15 = vector.broadcast %13 : vector<1x128xf32> to vector<8x128xf32>
    %16 = arith.mulf %14, %15 : vector<8x128xf32>
    %17 = arith.addf %11, %16 : vector<8x128xf32>
    %18 = vector.extract_strided_slice %4 {offsets = [0, 2], sizes = [8, 1], strides = [1, 1]} : vector<8x4xf32> to vector<8x1xf32>
    %19 = vector.extract_strided_slice %6 {offsets = [2, 0], sizes = [1, 128], strides = [1, 1]} : vector<4x128xf32> to vector<1x128xf32>
    %20 = vector.broadcast %18 : vector<8x1xf32> to vector<8x128xf32>
    %21 = vector.broadcast %19 : vector<1x128xf32> to vector<8x128xf32>
    %22 = arith.mulf %20, %21 : vector<8x128xf32>
    %23 = arith.addf %17, %22 : vector<8x128xf32>
    %24 = vector.extract_strided_slice %4 {offsets = [0, 3], sizes = [8, 1], strides = [1, 1]} : vector<8x4xf32> to vector<8x1xf32>
    %25 = vector.extract_strided_slice %6 {offsets = [3, 0], sizes = [1, 128], strides = [1, 1]} : vector<4x128xf32> to vector<1x128xf32>
    %26 = vector.broadcast %24 : vector<8x1xf32> to vector<8x128xf32>
    %27 = vector.broadcast %25 : vector<1x128xf32> to vector<8x128xf32>
    %28 = arith.mulf %26, %27 : vector<8x128xf32>
    %29 = arith.addf %23, %28 : vector<8x128xf32>
    %c0_7 = arith.constant 0 : index
    %c0_8 = arith.constant 0 : index
    %c0_9 = arith.constant 0 : index
    %30 = vector.load %arg6[%c0_7, %c0_8, %c0_9] : memref<1x1x128xf32, #tpu.memory_space<vmem>>, vector<1x1x128xf32>
    %31 = vector.shape_cast %30 : vector<1x1x128xf32> to vector<1x128xf32>
    %32 = vector.broadcast %31 : vector<1x128xf32> to vector<8x128xf32>
    %33 = arith.addf %29, %32 : vector<8x128xf32>
    %c0_10 = arith.constant 0 : index
    %c0_11 = arith.constant 0 : index
    %c0_12 = arith.constant 0 : index
    %34 = vector.load %arg3[%c0_10, %c0_11, %c0_12] : memref<1x1x128xf32, #tpu.memory_space<vmem>>, vector<1x1x128xf32>
    %35 = vector.shape_cast %34 : vector<1x1x128xf32> to vector<1x128xf32>
    %36 = vector.broadcast %35 : vector<1x128xf32> to vector<8x128xf32>
    %37 = arith.addf %3, %36 : vector<8x128xf32>
    %38 = arith.addf %37, %33 : vector<8x128xf32>
    %39 = arith.truncf %38 : vector<8x128xf32> to vector<8x128xbf16>
    %c0_13 = arith.constant 0 : index
    %c0_14 = arith.constant 0 : index
    %c0_15 = arith.constant 0 : index
    %40 = vector.load %arg7[%c0_13, %c0_14, %c0_15] : memref<1x128x384xbf16, #tpu.memory_space<vmem>>, vector<1x128x384xbf16>
    %41 = vector.shape_cast %40 : vector<1x128x384xbf16> to vector<128x384xbf16>
    %cst = arith.constant dense<0.000000e+00> : vector<8x384xf32>
    %42 = tpu.matmul %39, %41, %cst {dimension_numbers = #tpu.dot_dimension_numbers<[1], [0], [0], [1], [0, 0, 1, 1], [], []>} : vector<8x128xbf16>, vector<128x384xbf16>, vector<8x384xf32> -> vector<8x384xf32>
    %c0_16 = arith.constant 0 : index
    %c0_17 = arith.constant 0 : index
    %c0_18 = arith.constant 0 : index
    %43 = vector.load %arg8[%c0_16, %c0_17, %c0_18] : memref<1x1x384xf32, #tpu.memory_space<vmem>>, vector<1x1x384xf32>
    %44 = vector.shape_cast %43 : vector<1x1x384xf32> to vector<1x384xf32>
    %45 = vector.broadcast %44 : vector<1x384xf32> to vector<8x384xf32>
    %46 = arith.addf %42, %45 : vector<8x384xf32>
    %47 = vector.extract_strided_slice %46 {offsets = [0, 0], sizes = [8, 128], strides = [1, 1]} : vector<8x384xf32> to vector<8x128xf32>
    %48 = vector.extract_strided_slice %46 {offsets = [0, 128], sizes = [8, 128], strides = [1, 1]} : vector<8x384xf32> to vector<8x128xf32>
    %49 = vector.extract_strided_slice %46 {offsets = [0, 256], sizes = [8, 128], strides = [1, 1]} : vector<8x384xf32> to vector<8x128xf32>
    %50 = arith.truncf %47 : vector<8x128xf32> to vector<8x128xbf16>
    %51 = arith.truncf %48 : vector<8x128xf32> to vector<8x128xbf16>
    %cst_19 = arith.constant dense<0.000000e+00> : vector<8x8xf32>
    %52 = tpu.matmul %50, %51, %cst_19 {dimension_numbers = #tpu.dot_dimension_numbers<[1], [1], [0], [0], [0, 0, 1, 0], [], []>} : vector<8x128xbf16>, vector<8x128xbf16>, vector<8x8xf32> -> vector<8x8xf32>
    %cst_20 = arith.constant dense<0xFF800000> : vector<8xf32>
    %53 = vector.multi_reduction <maximumf>, %52, %cst_20 [1] : vector<8x8xf32> to vector<8xf32>
    %54 = vector.shape_cast %53 : vector<8xf32> to vector<8x1xf32>
    %55 = vector.broadcast %54 : vector<8x1xf32> to vector<8x8xf32>
    %56 = arith.subf %52, %55 : vector<8x8xf32>
    %57 = math.exp %56 : vector<8x8xf32>
    %cst_21 = arith.constant dense<0.000000e+00> : vector<8xf32>
    %58 = vector.multi_reduction <add>, %57, %cst_21 [1] : vector<8x8xf32> to vector<8xf32>
    %59 = vector.shape_cast %58 : vector<8xf32> to vector<8x1xf32>
    %60 = tpu.reciprocal %59 {approx = true} : vector<8x1xf32> -> vector<8x1xf32>
    %61 = vector.broadcast %60 : vector<8x1xf32> to vector<8x8xf32>
    %62 = arith.mulf %57, %61 : vector<8x8xf32>
    %63 = arith.truncf %62 : vector<8x8xf32> to vector<8x8xbf16>
    %64 = arith.truncf %49 : vector<8x128xf32> to vector<8x128xbf16>
    %cst_22 = arith.constant dense<0.000000e+00> : vector<8x128xf32>
    %65 = tpu.matmul %63, %64, %cst_22 {dimension_numbers = #tpu.dot_dimension_numbers<[1], [0], [0], [1], [0, 0, 1, 1], [], []>} : vector<8x8xbf16>, vector<8x128xbf16>, vector<8x128xf32> -> vector<8x128xf32>
    %66 = arith.addf %38, %65 : vector<8x128xf32>
    %67 = arith.truncf %66 : vector<8x128xf32> to vector<8x128xbf16>
    %c0_23 = arith.constant 0 : index
    %c0_24 = arith.constant 0 : index
    %c0_25 = arith.constant 0 : index
    %68 = vector.load %arg9[%c0_23, %c0_24, %c0_25] : memref<1x128x256xbf16, #tpu.memory_space<vmem>>, vector<1x128x256xbf16>
    %69 = vector.shape_cast %68 : vector<1x128x256xbf16> to vector<128x256xbf16>
    %cst_26 = arith.constant dense<0.000000e+00> : vector<8x256xf32>
    %70 = tpu.matmul %67, %69, %cst_26 {dimension_numbers = #tpu.dot_dimension_numbers<[1], [0], [0], [1], [0, 0, 1, 1], [], []>} : vector<8x128xbf16>, vector<128x256xbf16>, vector<8x256xf32> -> vector<8x256xf32>
    %c0_27 = arith.constant 0 : index
    %c0_28 = arith.constant 0 : index
    %c0_29 = arith.constant 0 : index
    %71 = vector.load %arg10[%c0_27, %c0_28, %c0_29] : memref<1x1x256xf32, #tpu.memory_space<vmem>>, vector<1x1x256xf32>
    %72 = vector.shape_cast %71 : vector<1x1x256xf32> to vector<1x256xf32>
    %73 = vector.broadcast %72 : vector<1x256xf32> to vector<8x256xf32>
    %74 = arith.addf %70, %73 : vector<8x256xf32>
    %cst_30 = arith.constant 0.000000e+00 : f32
    %75 = vector.broadcast %cst_30 : f32 to vector<8x256xf32>
    %76 = arith.maximumf %74, %75 : vector<8x256xf32>
    %77 = arith.truncf %76 : vector<8x256xf32> to vector<8x256xbf16>
    %c0_31 = arith.constant 0 : index
    %c0_32 = arith.constant 0 : index
    %c0_33 = arith.constant 0 : index
    %78 = vector.load %arg11[%c0_31, %c0_32, %c0_33] : memref<1x256x128xbf16, #tpu.memory_space<vmem>>, vector<1x256x128xbf16>
    %79 = vector.shape_cast %78 : vector<1x256x128xbf16> to vector<256x128xbf16>
    %cst_34 = arith.constant dense<0.000000e+00> : vector<8x128xf32>
    %80 = tpu.matmul %77, %79, %cst_34 {dimension_numbers = #tpu.dot_dimension_numbers<[1], [0], [0], [1], [0, 0, 1, 1], [], []>} : vector<8x256xbf16>, vector<256x128xbf16>, vector<8x128xf32> -> vector<8x128xf32>
    %c0_35 = arith.constant 0 : index
    %c0_36 = arith.constant 0 : index
    %c0_37 = arith.constant 0 : index
    %81 = vector.load %arg12[%c0_35, %c0_36, %c0_37] : memref<1x1x128xf32, #tpu.memory_space<vmem>>, vector<1x1x128xf32>
    %82 = vector.shape_cast %81 : vector<1x1x128xf32> to vector<1x128xf32>
    %83 = vector.broadcast %82 : vector<1x128xf32> to vector<8x128xf32>
    %84 = arith.addf %80, %83 : vector<8x128xf32>
    %85 = arith.addf %66, %84 : vector<8x128xf32>
    %c0_38 = arith.constant 0 : index
    %c0_39 = arith.constant 0 : index
    %86 = vector.load %arg18[%c0_38, %c0_39] : memref<8x128xf32, #tpu.memory_space<vmem>>, vector<8x128xf32>
    tpu.vector_store %arg18[%c0_38, %c0_39], %85 {strides = array<i32>} : memref<8x128xf32, #tpu.memory_space<vmem>>, vector<8x128xf32>,
    %87 = arith.truncf %85 : vector<8x128xf32> to vector<8x128xbf16>
    %c0_40 = arith.constant 0 : index
    %c0_41 = arith.constant 0 : index
    %c0_42 = arith.constant 0 : index
    %88 = vector.load %arg13[%c0_40, %c0_41, %c0_42] : memref<1x128x128xbf16, #tpu.memory_space<vmem>>, vector<1x128x128xbf16>
    %89 = vector.shape_cast %88 : vector<1x128x128xbf16> to vector<128x128xbf16>
    %cst_43 = arith.constant dense<0.000000e+00> : vector<8x128xf32>
    %90 = tpu.matmul %87, %89, %cst_43 {dimension_numbers = #tpu.dot_dimension_numbers<[1], [0], [0], [1], [0, 0, 1, 1], [], []>} : vector<8x128xbf16>, vector<128x128xbf16>, vector<8x128xf32> -> vector<8x128xf32>
    %c0_44 = arith.constant 0 : index
    %c0_45 = arith.constant 0 : index
    %c0_46 = arith.constant 0 : index
    %91 = vector.load %arg14[%c0_44, %c0_45, %c0_46] : memref<1x1x128xf32, #tpu.memory_space<vmem>>, vector<1x1x128xf32>
    %92 = vector.shape_cast %91 : vector<1x1x128xf32> to vector<1x128xf32>
    %93 = vector.broadcast %92 : vector<1x128xf32> to vector<8x128xf32>
    %94 = arith.addf %90, %93 : vector<8x128xf32>
    %95 = vector.extract_strided_slice %94 {offsets = [0, 4], sizes = [8, 4], strides = [1, 1]} : vector<8x128xf32> to vector<8x4xf32>
    %96 = vector.extract_strided_slice %4 {offsets = [0, 0], sizes = [8, 2], strides = [1, 1]} : vector<8x4xf32> to vector<8x2xf32>
    %97 = vector.extract_strided_slice %95 {offsets = [0, 0], sizes = [8, 2], strides = [1, 1]} : vector<8x4xf32> to vector<8x2xf32>
    %98 = vector.extract_strided_slice %4 {offsets = [0, 2], sizes = [8, 2], strides = [1, 1]} : vector<8x4xf32> to vector<8x2xf32>
    %99 = arith.mulf %97, %98 : vector<8x2xf32>
    %100 = arith.addf %96, %99 : vector<8x2xf32>
    %101 = vector.extract_strided_slice %4 {offsets = [0, 2], sizes = [8, 2], strides = [1, 1]} : vector<8x4xf32> to vector<8x2xf32>
    %102 = vector.extract_strided_slice %95 {offsets = [0, 2], sizes = [8, 2], strides = [1, 1]} : vector<8x4xf32> to vector<8x2xf32>
    %cst_47 = arith.constant 4.13516665 : f32
    %103 = vector.broadcast %cst_47 : f32 to vector<8x2xf32>
    %104 = arith.minimumf %102, %103 : vector<8x2xf32>
    %105 = math.exp %104 : vector<8x2xf32>
    %106 = arith.mulf %101, %105 : vector<8x2xf32>
    %107 = tpu.concatenate %100, %106 in 1 : vector<8x2xf32>, vector<8x2xf32> -> vector<8x4xf32>
    %c0_48 = arith.constant 0 : index
    %c0_49 = arith.constant 0 : index
    %108 = vector.load %arg19[%c0_48, %c0_49] : memref<8x4xf32, #tpu.memory_space<vmem>>, vector<8x4xf32>
    tpu.vector_store %arg19[%c0_48, %c0_49], %107 {strides = array<i32>} : memref<8x4xf32, #tpu.memory_space<vmem>>, vector<8x4xf32>,
    %c1_i32 = arith.constant 1 : i32
    %109 = arith.cmpi eq, %arg1, %c1_i32 : i32
    %110 = arith.extui %109 : i1 to i32
    %c0_i32_50 = arith.constant 0 : i32
    %111 = arith.cmpi ne, %110, %c0_i32_50 : i32
    scf.if %111 {
      %c0_51 = arith.constant 0 : index
      %c0_52 = arith.constant 0 : index
      %c0_53 = arith.constant 0 : index
      %112 = vector.load %arg15[%c0_51, %c0_52, %c0_53] : memref<1x8x128xf32, #tpu.memory_space<vmem>>, vector<1x8x128xf32>
      %113 = vector.shape_cast %112 : vector<1x8x128xf32> to vector<8x128xf32>
      %114 = vector.shape_cast %94 : vector<8x128xf32> to vector<1x8x128xf32>
      tpu.vector_store %arg15[%c0_51, %c0_52, %c0_53], %114 {strides = array<i32>} : memref<1x8x128xf32, #tpu.memory_space<vmem>>, vector<1x8x128xf32>,
      %c0_54 = arith.constant 0 : index
      %c0_55 = arith.constant 0 : index
      %c0_56 = arith.constant 0 : index
      %115 = vector.load %arg16[%c0_54, %c0_55, %c0_56] : memref<1x8x4xf32, #tpu.memory_space<vmem>>, vector<1x8x4xf32>
      %116 = vector.shape_cast %115 : vector<1x8x4xf32> to vector<8x4xf32>
      %117 = vector.shape_cast %107 : vector<8x4xf32> to vector<1x8x4xf32>
      tpu.vector_store %arg16[%c0_54, %c0_55, %c0_56], %117 {strides = array<i32>} : memref<1x8x4xf32, #tpu.memory_space<vmem>>, vector<1x8x4xf32>,
      %118 = arith.negf %94 : vector<8x128xf32>
      %119 = math.exp %118 : vector<8x128xf32>
      %cst_57 = arith.constant 1.000000e+00 : f32
      %120 = vector.broadcast %cst_57 : f32 to vector<8x128xf32>
      %121 = arith.addf %120, %119 : vector<8x128xf32>
      %122 = arith.divf %120, %121 : vector<8x128xf32>
      %c0_58 = arith.constant 0 : index
      %c0_59 = arith.constant 0 : index
      %c0_60 = arith.constant 0 : index
      %123 = vector.load %arg17[%c0_58, %c0_59, %c0_60] : memref<1x8x128xf32, #tpu.memory_space<vmem>>, vector<1x8x128xf32>
      %124 = vector.shape_cast %123 : vector<1x8x128xf32> to vector<8x128xf32>
      %125 = vector.shape_cast %122 : vector<8x128xf32> to vector<1x8x128xf32>
      tpu.vector_store %arg17[%c0_58, %c0_59, %c0_60], %125 {strides = array<i32>} : memref<1x8x128xf32, #tpu.memory_space<vmem>>, vector<1x8x128xf32>,
    } else {
    }
    return
  }
  func.func @transform_0(%arg0: i32, %arg1: i32) -> (i32, i32) {
    %c0_i32 = arith.constant 0 : i32
    %c0_i32_0 = arith.constant 0 : i32
    %c0_i32_1 = arith.constant 0 : i32
    return %c0_i32, %c0_i32_0 : i32, i32
  }
  func.func @transform_1(%arg0: i32, %arg1: i32) -> (i32, i32, i32) {
    %c0_i32 = arith.constant 0 : i32
    %c0_i32_0 = arith.constant 0 : i32
    %c0_i32_1 = arith.constant 0 : i32
    return %arg0, %c0_i32, %c0_i32_0 : i32, i32, i32
  }
  func.func @transform_2(%arg0: i32, %arg1: i32) -> (i32, i32) {
    %c0_i32 = arith.constant 0 : i32
    %c0_i32_0 = arith.constant 0 : i32
    %c0_i32_1 = arith.constant 0 : i32
    return %c0_i32, %c0_i32_0 : i32, i32
  }
  func.func @transform_3(%arg0: i32, %arg1: i32) -> (i32, i32, i32) {
    %c0_i32 = arith.constant 0 : i32
    %c0_i32_0 = arith.constant 0 : i32
    %c0_i32_1 = arith.constant 0 : i32
    return %arg1, %c0_i32, %c0_i32_0 : i32, i32, i32
  }
  func.func @transform_4(%arg0: i32, %arg1: i32) -> (i32, i32, i32) {
    %c0_i32 = arith.constant 0 : i32
    %c0_i32_0 = arith.constant 0 : i32
    %c0_i32_1 = arith.constant 0 : i32
    return %arg1, %c0_i32, %c0_i32_0 : i32, i32, i32
  }
  func.func @transform_5(%arg0: i32, %arg1: i32) -> (i32, i32, i32) {
    %c0_i32 = arith.constant 0 : i32
    %c0_i32_0 = arith.constant 0 : i32
    %c0_i32_1 = arith.constant 0 : i32
    return %arg1, %c0_i32, %c0_i32_0 : i32, i32, i32
  }
  func.func @transform_6(%arg0: i32, %arg1: i32) -> (i32, i32, i32) {
    %c0_i32 = arith.constant 0 : i32
    %c0_i32_0 = arith.constant 0 : i32
    %c0_i32_1 = arith.constant 0 : i32
    return %arg1, %c0_i32, %c0_i32_0 : i32, i32, i32
  }
  func.func @transform_7(%arg0: i32, %arg1: i32) -> (i32, i32, i32) {
    %c0_i32 = arith.constant 0 : i32
    %c0_i32_0 = arith.constant 0 : i32
    %c0_i32_1 = arith.constant 0 : i32
    return %arg1, %c0_i32, %c0_i32_0 : i32, i32, i32
  }
  func.func @transform_8(%arg0: i32, %arg1: i32) -> (i32, i32, i32) {
    %c0_i32 = arith.constant 0 : i32
    %c0_i32_0 = arith.constant 0 : i32
    %c0_i32_1 = arith.constant 0 : i32
    return %arg1, %c0_i32, %c0_i32_0 : i32, i32, i32
  }
  func.func @transform_9(%arg0: i32, %arg1: i32) -> (i32, i32, i32) {
    %c0_i32 = arith.constant 0 : i32
    %c0_i32_0 = arith.constant 0 : i32
    %c0_i32_1 = arith.constant 0 : i32
    return %arg1, %c0_i32, %c0_i32_0 : i32, i32, i32
  }
  func.func @transform_10(%arg0: i32, %arg1: i32) -> (i32, i32, i32) {
    %c0_i32 = arith.constant 0 : i32
    %c0_i32_0 = arith.constant 0 : i32
    %c0_i32_1 = arith.constant 0 : i32
    return %arg1, %c0_i32, %c0_i32_0 : i32, i32, i32
  }
  func.func @transform_11(%arg0: i32, %arg1: i32) -> (i32, i32, i32) {
    %c0_i32 = arith.constant 0 : i32
    %c0_i32_0 = arith.constant 0 : i32
    %c0_i32_1 = arith.constant 0 : i32
    return %arg1, %c0_i32, %c0_i32_0 : i32, i32, i32
  }
  func.func @transform_12(%arg0: i32, %arg1: i32) -> (i32, i32, i32) {
    %c0_i32 = arith.constant 0 : i32
    %c0_i32_0 = arith.constant 0 : i32
    %c0_i32_1 = arith.constant 0 : i32
    return %arg1, %c0_i32, %c0_i32_0 : i32, i32, i32
  }
  func.func @transform_13(%arg0: i32, %arg1: i32) -> (i32, i32, i32) {
    %c0_i32 = arith.constant 0 : i32
    %c0_i32_0 = arith.constant 0 : i32
    %c0_i32_1 = arith.constant 0 : i32
    return %arg0, %c0_i32, %c0_i32_0 : i32, i32, i32
  }
  func.func @transform_14(%arg0: i32, %arg1: i32) -> (i32, i32, i32) {
    %c0_i32 = arith.constant 0 : i32
    %c0_i32_0 = arith.constant 0 : i32
    %c0_i32_1 = arith.constant 0 : i32
    return %arg0, %c0_i32, %c0_i32_0 : i32, i32, i32
  }
  func.func @transform_15(%arg0: i32, %arg1: i32) -> (i32, i32, i32) {
    %c0_i32 = arith.constant 0 : i32
    %c0_i32_0 = arith.constant 0 : i32
    %c0_i32_1 = arith.constant 0 : i32
    return %arg0, %c0_i32, %c0_i32_0 : i32, i32, i32
  }
}

</mosaic_0001>

<bundles_post_ra>
// kernel: mul.11
= control target key start
LH: loop header
LB: loop body
LE: loop exit
PB: predicated region body
PF: predicated region fallthrough
CT: control target
= control target key end

     0   :  { %s34_s0 = inlined_call_operand.vmem [shape: f32[48], index: 0, kind: input, shape index: {}]   ;;  %s35_s1 = inlined_call_operand.vmem [shape: f32[48], index: 1, kind: input, shape index: {}]   ;;  %s36_s2 = inlined_call_operand.vmem [shape: f32[48], index: 2, kind: output, shape index: {}]  }
   0x1   :  { %v3_v0 = vld [vmem:[%s34_s0] sm:$0x1] }
   0x2   :  { %v4_v1 = vld [vmem:[%s35_s1] sm:$0x1] }
   0x3   :  { %v7_v2 = vmul.f32 %v4_v1, %v3_v0 }
   0x5   :  { %9 = vst [vmem:[%s36_s2] sm:$0x1] %v7_v2 }

// kernel: e2evid_forward.2
= control target key start
LH: loop header
LB: loop body
LE: loop exit
PB: predicated region body
PF: predicated region fallthrough
CT: control target
= control target key end

     0   :  { %s555_s12 = smov 0   ;;  %s557_s13 = smov 0   ;;  %s604_s0 = inlined_call_operand.vmem [shape: bf16[2,64,48], index: 0, kind: input, shape index: {}]   ;;  %s605_s1 = inlined_call_operand.vmem [shape: bf16[48,128], index: 1, kind: input, shape index: {}]   ;;  %s606_s2 = inlined_call_operand.vmem [shape: f32[1,128], index: 2, kind: input, shape index: {}]   ;;  %s607_s3 = inlined_call_operand.vmem [shape: f32[2,1,128], index: 3, kind: output, shape index: {}]  }
   0x1   :  { %s559_s14 = smov 0  }
   0x2 LB: > { %s25_s15 = sadd.s32 1, %s528_s13  ;;  %p433_p0 = scmp.ge.s32.totalorder %s532_s14, 1  ;;  %s532_s14 = sphi %s559_s14, %s13_s14   ;;  %s528_s13 = sphi %s557_s13, %s609_s13   ;;  %s524_s12 = sphi %s555_s12, %s608_s12  }
   0x3   : > { %p27_p1 = scmp.ge.s32.totalorder %s25_s15, 2  ;;  %p156_p2 = scmp.lt.s32.totalorder %s532_s14, 3 }
   0x5   : > { %s611_s15 = smov (%p27_p1, %s25_s15), 0  ;;  %p157_p3 = pnand %p433_p0, %p156_p2 }
   0x6   : > { %p183_p4 = scmp.lt.s32.totalorder (!%p157_p3), %s524_s12, 1 }
   0x7   : > { %160 = sbr.rel (%p157_p3) target bundleno = 267 (0x10b), region = 32 }
   0xc   : > { %v503_v0 = vld [vmem:[%s605_s1 + $0x10] sm:$0xff]   ;;  %v504_v1 = vld [vmem:[%s605_s1 + $0x8] sm:$0xff]   ;;  %s613_s12 = smov (!%p183_p4, %s524_s12), 1  ;;  %v505_v2 = vld [vmem:[%s605_s1] sm:$0xff]   ;;  %vm260_vm0 = vcmask 392192   ;;  %v534_v7 = vmov 0.0  }
   0xd   : > { %458 = vmatprep.subr.bf16.mxu0 %v503_v0  ;;  %472 = vmatprep.subr.bf16.mxu1 %v503_v0  ;;  %s450_s22 = sshll.u32 %s613_s12, 5  ;;  %200 = vst [vmem:[#allocation2] sm:$0x1] %v534_v7  ;;  %v436_v12 = vld [vmem:[%s606_s2] ss:$0 sm:$0xff]  ;;  %s194_s30 = scalar_lea.vmem %s607_s3, %s613_s12 }
   0xe   : > { %459 = vmatpush3.bf16.msra.mxu0 %v503_v0  ;;  %475 = vmatpush3.bf16.msra.mxu1 %v503_v0  ;;  %s190_s25 = scalar_lea.vmem %s604_s0, %s450_s22 }
   0xf   : > { %460 = vmatprep.subr.bf16.mxu0 %v504_v1  ;;  %473 = vmatprep.subr.bf16.mxu1 %v504_v1  ;;  %v506_v3 = vld [vmem:[%s190_s25] sm:$0xff]   ;;  %v508_v4 = vld [vmem:[%s190_s25 + $0x10] sm:$0xff]   ;;  %v507_v5 = vld [vmem:[%s190_s25 + $0x8] sm:$0xff]  }
  0x10   : > { %464 = vmatprep.mubr.msk.bf16.mxu0 %vm260_vm0, %v506_v3  ;;  %468 = vmatprep.mubr.msk.bf16.mxu1 %vm260_vm0, %v508_v4  ;;  %v509_v6 = vld [vmem:[%s190_s25 + $0x18] sm:$0xff]  }
  0x12   : > { %461 = vmatpush3.bf16.msra.mxu0 %v504_v1  ;;  %476 = vmatpush3.bf16.msra.mxu1 %v504_v1 }
  0x13   : > { %462 = vmatprep.subr.bf16.mxu0 %v505_v2  ;;  %474 = vmatprep.subr.bf16.mxu1 %v505_v2 }
  0x14   : > { %v346_v45 = vld [vmem:[#allocation2] sm:$0x1] }
  0x16   : > { %463 = vmatpush3.bf16.msra.mxu0 %v505_v2  ;;  %477 = vmatpush3.bf16.msra.mxu1 %v505_v2 }
  0x19   : > { %465 = vmatmul.mubr.msk.bf16.vlgmr.msra.gmra.mxu0 %vm260_vm0, %v507_v5  ;;  %469 = vmatmul.mubr.msk.bf16.vlgmr.msra.gmra.mxu1 %vm260_vm0, %v509_v6 }
  0xd9   : > { %v466_v8 = vpop.f32.mrf.mxu0  ;;  %v470_v9 = vpop.f32.mrf.mxu1 }
  0xda   : > { %v316_v17 = vadd.f32 %v466_v8, %v436_v12  ;;  %v332_v29 = vadd.f32 %v470_v9, %v436_v12 }
  0xdb   : > { %v307_v10 = vpop.f32.mrf.mxu0  ;;  %v323_v11 = vpop.f32.mrf.mxu1 }
  0xdc   : > { %v308_v14 = vadd.f32 %v436_v12, %v307_v10  ;;  %v340_v23 = vmax.f32 %v316_v17, 0.0  ;;  %v324_v24 = vadd.f32 %v436_v12, %v323_v11  ;;  %v344_v35 = vmax.f32 %v332_v29, 0.0 }
  0xdd   : > { %v467_v13 = vpop.f32.mrf.mxu0  ;;  %v471_v16 = vpop.f32.mrf.mxu1 }
  0xde   : > { %v338_v19 = vmax.f32 %v308_v14, 0.0  ;;  %v319_v20 = vadd.f32 %v467_v13, %v436_v12  ;;  %v342_v30 = vmax.f32 %v324_v24, 0.0  ;;  %v335_v32 = vadd.f32 %v471_v16, %v436_v12 }
  0xdf   : > { %v310_v15 = vpop.f32.mrf.mxu0  ;;  %v326_v22 = vpop.f32.mrf.mxu1 }
  0xe0   : > { %v311_v18 = vadd.f32 %v436_v12, %v310_v15  ;;  %v341_v26 = vmax.f32 %v319_v20, 0.0  ;;  %v327_v28 = vadd.f32 %v436_v12, %v326_v22  ;;  %v345_v37 = vmax.f32 %v335_v32, 0.0 }
  0xe2   : > { %v339_v21 = vmax.f32 %v311_v18, 0.0  ;;  %v343_v33 = vmax.f32 %v327_v28, 0.0 }
  0xe4   : > { %v347_v25 = vadd.f32 %v339_v21, %v338_v19 }
  0xe6   : > { %v348_v27 = vadd.f32 %v347_v25, %v340_v23 }
  0xe8   : > { %v349_v31 = vadd.f32 %v348_v27, %v341_v26 }
  0xea   : > { %v350_v34 = vadd.f32 %v349_v31, %v342_v30 }
  0xec   : > { %v351_v36 = vadd.f32 %v350_v34, %v343_v33 }
  0xee   : > { %v352_v38 = vadd.f32 %v351_v36, %v344_v35 }
  0xf0   : > { %v353_v39 = vadd.f32 %v352_v38, %v345_v37 }
  0xf2   : > { %v354_v40 = vrot.slane %v353_v39, 4 }
  0xf4   : > { %v355_v41 = vadd.f32 %v354_v40, %v353_v39 }
  0xf6   : > { %v356_v42 = vrot.slane %v355_v41, 2 }
  0xf8   : > { %v357_v43 = vadd.f32 %v356_v42, %v355_v41 }
  0xfa   : > { %v358_v44 = vrot.slane %v357_v43, 1 }
  0xfc   : > { %v359_v46 = vadd.f32 %v358_v44, %v357_v43 }
  0xfe   : > { %v360_v47 = vadd.f32 %v359_v46, %v346_v45 }
 0x100   : > { %361 = vst [vmem:[#allocation2] sm:$0x1] %v360_v47 }
 0x107   : > { %v365_v48 = vld [vmem:[#allocation2] sm:$0x1] }
 0x108   : > { %v366_v49 = vmul.f32 0.015625, %v365_v48 }
 0x10a   : > { %367 = vst [vmem:[%s194_s30] sm:$0x1] %v366_v49 }
 0x10b PF: > { %s13_s14 = sadd.s32 1, %s532_s14   ;;  %s608_s12 = smov %s528_s13 }
 0x10c   : > { %p10_p5 = scmp.ge.s32.totalorder %s13_s14, 4   ;;  %s609_s13 = smov %s611_s15 }
 0x10e   :  { %12 = sbr.rel (!%p10_p5) target bundleno = 2 (0x2), region = 70 }

// kernel: tile.9
= control target key start
LH: loop header
LB: loop body
LE: loop exit
PB: predicated region body
PF: predicated region fallthrough
CT: control target
= control target key end

     0   :  { %s69_s10 = smov 28   ;;  %s70_s11 = smov 20   ;;  %vm3_vm0 = vcmask 31744   ;;  %vm9_vm1 = vcmask 261344   ;;  %vm15_vm2 = vcmask 228544   ;;  %vm21_vm3 = vcmask 195744   ;;  %s113_s0 = inlined_call_operand.vmem [shape: s32[8,4], index: 0, kind: input, shape index: {}]   ;;  %s114_s1 = inlined_call_operand.vmem [shape: s32[32], index: 1, kind: output, shape index: {}]  }
   0x1   :  { %v55_v0 = vld [vmem:[%s113_s0 + $0x7] sm:$0x1]   ;;  %v57_v1 = vld [vmem:[%s113_s0 + $0x5] sm:$0x1]   ;;  %v56_v2 = vld [vmem:[%s113_s0 + $0x6] sm:$0x1]  }
   0x2   :  { %7 = vrot.lane.b32.xlu0 %v55_v0, %s69_s10  ;;  %19 = vrot.lane.b32.xlu1 %v57_v1, %s70_s11  ;;  %v58_v3 = vld [vmem:[%s113_s0 + $0x4] sm:$0x1]   ;;  %v2_v4 = vld [vmem:[%s113_s0] sm:$0x1]   ;;  %s71_s18 = smov 24   ;;  %s72_s19 = smov 16  }
   0x3   :  { %4 = vst.msk [vmem:[#allocation0] sm:$0x1] %vm3_vm0, %v2_v4   ;;  %v59_v5 = vld [vmem:[%s113_s0 + $0x3] sm:$0x1]   ;;  %v60_v6 = vld [vmem:[%s113_s0 + $0x2] sm:$0x1]  }
   0x4   :  { %s73_s24 = smov 12   ;;  %s74_s25 = smov 8   ;;  %v61_v7 = vld [vmem:[%s113_s0 + $0x1] sm:$0x1]   ;;  %vm27_vm4 = vcmask 162944   ;;  %vm33_vm5 = vcmask 130144  }
   0x5   :  { %s75_s0 = smov 4   ;;  %vm39_vm6 = vcmask 97344   ;;  %vm45_vm7 = vcmask 64544  }
   0x6   :  { %13 = vrot.lane.b32.xlu0 %v56_v2, %s71_s18  ;;  %25 = vrot.lane.b32.xlu1 %v58_v3, %s72_s19 }
   0xa   :  { %31 = vrot.lane.b32.xlu0 %v59_v5, %s73_s24  ;;  %37 = vrot.lane.b32.xlu1 %v60_v6, %s74_s25 }
   0xe   :  { %43 = vrot.lane.b32.xlu0 %v61_v7, %s75_s0 }
  0x74   :  { %v8_v8 = vpop.permute.xlu0 %7   ;;  %v20_v9 = vpop.permute.xlu1 %19  }
  0x75   :  { %10 = vst.msk [vmem:[#allocation0] sm:$0x1] %vm9_vm1, %v8_v8  }
  0x78   :  { %v14_v10 = vpop.permute.xlu0 %13   ;;  %v26_v11 = vpop.permute.xlu1 %25  }
  0x79   :  { %16 = vst.msk [vmem:[#allocation0] sm:$0x1] %vm15_vm2, %v14_v10  }
  0x7a   :  { %22 = vst.msk [vmem:[#allocation0] sm:$0x1] %vm21_vm3, %v20_v9  }
  0x7b   :  { %28 = vst.msk [vmem:[#allocation0] sm:$0x1] %vm27_vm4, %v26_v11  }
  0x7c   :  { %v32_v12 = vpop.permute.xlu0 %31   ;;  %v38_v13 = vpop.permute.xlu1 %37  }
  0x7d   :  { %34 = vst.msk [vmem:[#allocation0] sm:$0x1] %vm33_vm5, %v32_v12  }
  0x7e   :  { %40 = vst.msk [vmem:[#allocation0] sm:$0x1] %vm39_vm6, %v38_v13  }
  0x80   :  { %v44_v14 = vpop.permute.xlu0 %43  }
  0x81   :  { %46 = vst.msk [vmem:[#allocation0] sm:$0x1] %vm45_vm7, %v44_v14  }
  0x88   :  { %v51_v15 = vld [vmem:[#allocation0] sm:$0x1] }
  0x89   :  { %54 = vst [vmem:[%s114_s1] sm:$0x1] %v51_v15 }

// kernel: e2evid_forward.3
= control target key start
LH: loop header
LB: loop body
LE: loop exit
PB: predicated region body
PF: predicated region fallthrough
CT: control target
= control target key end

     0   :  { %s2762_s0 = inlined_call_operand.vmem [shape: f32[8,128], index: 0, kind: input, shape index: {}]   ;;  %s2763_s1 = inlined_call_operand.vmem [shape: f32[2,1,128], index: 1, kind: input, shape index: {}]   ;;  %s2764_s2 = inlined_call_operand.vmem [shape: f32[8,4], index: 2, kind: input, shape index: {}]   ;;  %s2765_s3 = inlined_call_operand.vmem [shape: f32[2,4,128], index: 3, kind: input, shape index: {}]   ;;  %s2766_s4 = inlined_call_operand.vmem [shape: f32[2,1,128], index: 4, kind: input, shape index: {}]   ;;  %s2767_s5 = inlined_call_operand.vmem [shape: bf16[2,128,384], index: 5, kind: input, shape index: {}]   ;;  %s2768_s6 = inlined_call_operand.vmem [shape: f32[2,1,384], index: 6, kind: input, shape index: {}]   ;;  %s2769_s7 = inlined_call_operand.vmem [shape: bf16[2,128,256], index: 7, kind: input, shape index: {}]   ;;  %s2770_s8 = inlined_call_operand.vmem [shape: f32[2,1,256], index: 8, kind: input, shape index: {}]   ;;  %s2771_s9 = inlined_call_operand.vmem [shape: bf16[2,256,128], index: 9, kind: input, shape index: {}]   ;;  %s2772_s10 = inlined_call_operand.vmem [shape: f32[2,1,128], index: 10, kind: input, shape index: {}]   ;;  %s2773_s11 = inlined_call_operand.vmem [shape: bf16[2,128,128], index: 11, kind: input, shape index: {}]   ;;  %s2774_s12 = inlined_call_operand.vmem [shape: f32[2,1,128], index: 12, kind: input, shape index: {}]   ;;  %s2775_s13 = inlined_call_operand.hbm [shape: f32[2,8,128], index: 13, kind: output, shape index: {0}]   ;;  %s2776_s14 = inlined_call_operand.vmem [shape: f32[2,8,4], index: 14, kind: output, shape index: {1}]   ;;  %s2777_s15 = inlined_call_operand.vmem [shape: f32[2,8,128], index: 15, kind: output, shape index: {2}]  }
   0x1   :  { %2794 = sst [smem:[#allocation21_spill]] %s2762_s0 }
   0x2   :  { %2795 = sst [smem:[#allocation22_spill]] %s2763_s1 }
   0x3   :  { %2796 = sst [smem:[#allocation23_spill]] %s2764_s2 }
   0x4   :  { %2797 = sst [smem:[#allocation24_spill]] %s2765_s3 }
   0x5   :  { %2798 = sst [smem:[#allocation25_spill]] %s2766_s4 }
   0x6   :  { %2799 = sst [smem:[#allocation26_spill]] %s2767_s5 }
   0x7   :  { %2800 = sst [smem:[#allocation27_spill]] %s2768_s6 }
   0x8   :  { %2801 = sst [smem:[#allocation28_spill]] %s2769_s7 }
   0x9   :  { %2802 = sst [smem:[#allocation29_spill]] %s2775_s13 }
   0xa   :  { %21 = vsyncpa [#allocation5], 0 }
   0xb   :  { %23 = vsyncpa [#allocation5 + $0x1], 0  ;;  %s2408_s18 = smov 0   ;;  %s2410_s19 = smov 0  }
   0xc   :  { %s2412_s20 = smov 0   ;;  %s2414_s21 = smov 0  }
   0xd   :  { %s2416_s22 = smov 0   ;;  %s2418_s23 = smov 0  }
   0xe   :  { %s2420_s24 = smov 0   ;;  %s2422_s25 = smov 0  }
   0xf LB: > { %2803 = sst [smem:[#allocation7_spill]] %s2289_s18  ;;  %s1857_s26 = sadd.s32 4294967295, %s2317_s25   ;;  %s2317_s25 = sphi %s2422_s25, %s29_s25   ;;  %s2313_s24 = sphi %s2420_s24, %s2851_s24   ;;  %s2309_s23 = sphi %s2418_s23, %s2850_s23   ;;  %s2305_s22 = sphi %s2416_s22, %s2849_s22   ;;  %s2301_s21 = sphi %s2414_s21, %s2848_s21   ;;  %s2297_s20 = sphi %s2412_s20, %s2847_s20   ;;  %s2293_s19 = sphi %s2410_s19, %s2846_s19   ;;  %s2289_s18 = sphi %s2408_s18, %s2845_s18  }
  0x10   : > { %2804 = sst [smem:[#allocation8_spill]] %s2293_s19  ;;  %s1858_s27 = sadd.s32 4294967294, %s2317_s25  }
  0x11   : > { %2805 = sst [smem:[#allocation9_spill]] %s2297_s20  ;;  %s38_s28 = sadd.s32 1, %s2309_s23 }
  0x12   : > { %2806 = sst [smem:[#allocation10_spill]] %s2301_s21  ;;  %p39_p0 = scmp.ge.s32.totalorder %s38_s28, 2 }
  0x13   : > { %2807 = sst [smem:[#allocation11_spill]] %s2305_s22  ;;  %s41_s29 = sadd.s32 1, %s2313_s24 }
  0x14   : > { %2808 = sst [smem:[#allocation12_spill]] %s2309_s23  ;;  %p386_p1 = scmp.ne.s32.totalorder %s2297_s20, %s2293_s19 }
  0x15   : > { %2809 = sst [smem:[#allocation13_spill]] %s2313_s24  ;;  %p387_p2 = scmp.eq.s32.totalorder %s1857_s26, 3 }
  0x16   : > { %2810 = sst [smem:[#allocation14_spill]] %s2317_s25  ;;  %s2853_s28 = smov (%p39_p0, %s38_s28), 0 }
  0x17   : > { %2811 = sst [smem:[#allocation15_spill]] %s2853_s28  ;;  %s2855_s29 = smov (!%p39_p0, %s41_s29), %s2313_s24 }
  0x18   : > { %p2457_p3 = por %p387_p2, %p386_p1  ;;  %p392_p4 = scmp.ne.s32.totalorder %s2293_s19, %s2289_s18 }
  0x19   : > { %p43_p5 = scmp.ge.s32.totalorder %s2855_s29, 2  ;;  %p393_p6 = scmp.eq.s32.totalorder %s1858_s27, 3 }
  0x1a   : > { %s2812_s30 = scalar_select %p2457_p3, 1, 0 }
  0x1b   : > { %p1861_p7 = scmp.ge.s32.totalorder %s2317_s25, 1  ;;  %p546_p8 = scmp.lt.s32.totalorder %s2317_s25, 5 }
  0x1c   : > { %2813 = sst [smem:[#allocation16_spill]] %s2812_s30  ;;  %s2857_s29 = smov (%p43_p5, %s2855_s29), 0 }
  0x1d   : > { %2814 = sst [smem:[#allocation17_spill]] %s2857_s29  ;;  %p2467_p9 = por %p393_p6, %p392_p4 }
  0x1e   : > { %p547_p10 = pnand %p1861_p7, %p546_p8  ;;  %s373_s17 = ssub.s32 %s2313_s24, %s2857_s29 }
  0x1f   : > { %s2815_s16 = scalar_select %p2467_p9, 1, 0 }
  0x20   : > { %s376_s26 = sadd.s32 1, %s2297_s20  ;;  %p374_p11 = scmp.eq.s32.totalorder %s373_s17, 0 }
  0x21   : > { %2816 = sst [smem:[#allocation18_spill]] %s2815_s16  ;;  %550 = sbr.rel (%p547_p10) target bundleno = 1919 (0x77f), region = 72 }
  0x22   : > { %s2475_s28 = scalar_select %p374_p11, %s2297_s20, %s376_s26  }
  0x24   : > { %2817 = sst [smem:[#allocation19_spill]] %s2475_s28 }
  0x26   : > { %s2781_s27 = sand.u32 1, %s2293_s19   ;;  %p641_p12 = scmp.lt.s32.totalorder %s2305_s22, 1 }
  0x27   : > { %s2481_s23 = sshll.u32 %s2781_s27, 3  ;;  %p644_p13 = scmp.lt.s32.totalorder %s2301_s21, 1 }
  0x28   : > { %s2485_s16 = scalar_select %p641_p12, %s2305_s22, 1 }
  0x29   : > { %s2488_s17 = scalar_select %p644_p13, %s2301_s21, 1 }
  0x2a   : > { %2818 = sst [smem:[#allocation20_spill]] %s2485_s16  ;;  %s1872_s24 = sshll.u32 %s2485_s16, 3 }
  0x2b   : > { %s1863_s28 = sshll.u32 %s2488_s17, 2  ;;  %s2821_s3 = sld [smem:[#allocation24_spill]] }
  0x2c   : > { %s2049_s26 = smul.u32 192, %s2488_s17  ;;  %s1950_s22 = sshll.u32 %s2488_s17, 7 }
  0x2d   : > { %s2050_s19 = smul.u32 3, %s2488_s17  ;;  %s2822_s5 = sld [smem:[#allocation26_spill]] }
  0x2e   : > { %s2823_s7 = sld [smem:[#allocation28_spill]]  ;;  %s2532_s2 = scalar_lea.vmem %s2771_s9, %s1950_s22 }
  0x2f   : > { %s2824_s6 = sld [smem:[#allocation27_spill]]  ;;  %s2551_s4 = scalar_lea.vmem %s2776_s14, %s1872_s24 }
  0x30   : > { %s628_s1 = scalar_lea.vmem [#allocation4], %s2481_s23  ;;  %s2825_s16 = sld [smem:[#allocation10_spill]] }
  0x31   : > { %s2503_s29 = scalar_lea.vmem %s2821_s3, %s1863_s28  ;;  %s1867_s28 = sshll.u32 %s2488_s17, 1 }
  0x32   : > { %s2527_s3 = scalar_lea.vmem %s2770_s8, %s1867_s28 }
  0x33   : > { %s2511_s27 = scalar_lea.vmem %s2822_s5, %s2049_s26  ;;  %s1952_s5 = sshll.u32 %s2488_s17, 6 }
  0x34   : > { %s2516_s21 = scalar_lea.vmem %s2823_s7, %s1950_s22  ;;  %s2556_s26 = scalar_lea.vmem %s2777_s15, %s1872_s24 }
  0x35   : > { %s2521_s13 = scalar_lea.vmem %s2824_s6, %s2050_s19  ;;  %s2542_s19 = scalar_lea.vmem %s2773_s11, %s1952_s5 }
  0x36   : > { %p1874_p0 = scmp.ne.s32.totalorder %s2825_s16, 0 }
  0x37   : > { %s2826_s18 = sld [smem:[#allocation21_spill]] (!%p1874_p0) }
  0x38   : > { %697 = sbr.rel (%p1874_p0) target bundleno = 64 (0x40), region = 76  ;;  %s2827_s25 = sld [smem:[#allocation23_spill]] (!%p1874_p0) }
  0x3d   : > { %v698_v0 = vld [vmem:[%s2826_s18] sm:$0xff]  ;;  %vm701_vm0 = vcmask 31744  }
  0x3e   : > { %v700_v1 = vld [vmem:[%s2827_s25] sm:$0xff]  ;;  %699 = vst [vmem:[#allocation2] sm:$0xff] %v698_v0 }
  0x3f   : > { %702 = vst.msk [vmem:[#allocation3] sm:$0xff] %vm701_vm0, %v700_v1 }
  0x40 PF: > { %v2319_v3 = vmov 0   ;;  %v2320_v4 = vmov 2   ;;  %v2135_v5 = vld [vmem:[%s2511_s27 + $0xac] ss:$12 sps:$4 sm:$0xff]   ;;  %v2137_v6 = vld [vmem:[%s2511_s27 + $0xa8] ss:$12 sps:$4 sm:$0xff]   ;;  %v711_v32 = vlaneseq  ;;  %s2834_s7 = scalar_lea.vmem %s2774_s12, %s2488_s17 }
  0x41   : > { %2130 = vset.pattern.permute.xlu0 %v2319_v3  ;;  %2132 = vset.pattern.permute.xlu1 %v2320_v4  ;;  %v2138_v7 = vld [vmem:[%s2511_s27 + $0xb0] ss:$12 sps:$4 sm:$0xff]   ;;  %v2321_v8 = vmov 0.0   ;;  %v2139_v9 = vld [vmem:[%s2511_s27 + $0x94] ss:$12 sps:$4 sm:$0xff]   ;;  %v2322_v12 = vmov 1  }
  0x42   : > { %941 = vmatprep.subr.bf16.mxu0 %v2135_v5  ;;  %1997 = vmatprep.subr.bf16.mxu1 %v2321_v8  ;;  %v2141_v10 = vld [vmem:[%s2511_s27 + $0x90] ss:$12 sps:$4 sm:$0xff]   ;;  %v2142_v11 = vld [vmem:[%s2511_s27 + $0x98] ss:$12 sps:$4 sm:$0xff]   ;;  %v2323_v13 = vmov 3   ;;  %vm2324_vm1 = vmmov 0  }
  0x43   : > { %942 = vmatpush1.bf16.msra.mxu0 %v2137_v6  ;;  %1998 = vmatpush3.bf16.msra.mxu1 %v2138_v7  ;;  %v2143_v14 = vld [vmem:[%s2511_s27 + $0x7c] ss:$12 sps:$4 sm:$0xff]   ;;  %v2145_v15 = vld [vmem:[%s2511_s27 + $0x78] ss:$12 sps:$4 sm:$0xff]   ;;  %v2146_v16 = vld [vmem:[%s2511_s27 + $0x80] ss:$12 sps:$4 sm:$0xff]  }
  0x44   : > { %943 = vmatprep.subr.bf16.mxu0 %v2139_v9  ;;  %1999 = vmatprep.subr.bf16.mxu1 %v2321_v8  ;;  %v2147_v17 = vld [vmem:[%s2511_s27 + $0x64] ss:$12 sps:$4 sm:$0xff]   ;;  %v2149_v18 = vld [vmem:[%s2511_s27 + $0x60] ss:$12 sps:$4 sm:$0xff]   ;;  %v2150_v19 = vld [vmem:[%s2511_s27 + $0x68] ss:$12 sps:$4 sm:$0xff]  }
  0x45   : > { %973 = vmatprep.mubr.bf16.mxu0 %v2319_v3  ;;  %v2151_v20 = vld [vmem:[%s2511_s27 + $0x4c] ss:$12 sps:$4 sm:$0xff]   ;;  %2013 = vmatprep.mubr.msk.bf16.mxu1 %vm2324_vm1, %v2321_v8  ;;  %v2153_v21 = vld [vmem:[%s2511_s27 + $0x48] ss:$12 sps:$4 sm:$0xff]   ;;  %v2154_v22 = vld [vmem:[%s2511_s27 + $0x50] ss:$12 sps:$4 sm:$0xff]  }
  0x46   : > { %v2566_v2 = vld [vmem:[#allocation3] sm:$0xff]  ;;  %v2155_v23 = vld [vmem:[%s2511_s27 + $0x34] ss:$12 sps:$4 sm:$0xff]   ;;  %v2157_v24 = vld [vmem:[%s2511_s27 + $0x30] ss:$12 sps:$4 sm:$0xff]   ;;  %v712_v33 = vshrl.u32 %v711_v32, 7 }
  0x47   : > { %708 = vperm.xlu0 %2130, %v2566_v2   ;;  %727 = vperm.xlu1 %2132, %v2566_v2   ;;  %v2158_v25 = vld [vmem:[%s2511_s27 + $0x38] ss:$12 sps:$4 sm:$0xff]   ;;  %v2159_v26 = vld [vmem:[%s2511_s27 + $0x1c] ss:$12 sps:$4 sm:$0xff]   ;;  %v2162_v28 = vld [vmem:[%s2511_s27 + $0x20] ss:$12 sps:$4 sm:$0xff]  }
  0x48   : > { %944 = vmatpush1.bf16.msra.mxu0 %v2141_v10  ;;  %2000 = vmatpush3.bf16.msra.mxu1 %v2142_v11  ;;  %v2161_v27 = vld [vmem:[%s2511_s27 + $0x18] ss:$12 sps:$4 sm:$0xff]   ;;  %v2165_v30 = vld [vmem:[%s2511_s27] ss:$12 sps:$4 sm:$0xff]   ;;  %v2166_v31 = vld [vmem:[%s2511_s27 + $0x8] ss:$12 sps:$4 sm:$0xff]  }
  0x49   : > { %945 = vmatprep.subr.bf16.mxu0 %v2143_v14  ;;  %2001 = vmatprep.subr.bf16.mxu1 %v2321_v8  ;;  %v2163_v29 = vld [vmem:[%s2511_s27 + $0x4] ss:$12 sps:$4 sm:$0xff]   ;;  %v2609_v34 = vsub.s32 0, %v712_v33  ;;  %v2611_v35 = vsub.s32 1, %v712_v33  ;;  %v705_v36 = vld [vmem:[%s2503_s29] sm:$0xf] }
  0x4a   : > { %s2828_s24 = sld [smem:[#allocation20_spill]]  ;;  %v732_v38 = vsub.s32 2, %v712_v33  ;;  %v742_v40 = vsub.s32 3, %v712_v33  ;;  %v703_v52 = vld [vmem:[#allocation2] sm:$0xff]  ;;  %vm1081_vm2 = vcmask 1043456   ;;  %vm1064_vm3 = vcmask 64512  }
  0x4b   : > { %2131 = vset.pattern.permute.xlu0 %v2322_v12  ;;  %2133 = vset.pattern.permute.xlu1 %v2323_v13  ;;  %v714_v41 = vrot.slane %v705_v36, %v2609_v34  ;;  %v723_v42 = vrot.slane %v705_v36, %v2611_v35  ;;  %s2829_s16 = sld [smem:[#allocation22_spill]]  ;;  %v796_v61 = vld [vmem:[%s2521_s13] sm:$0x7]  ;;  %v2175_v32 = vld [vmem:[%s2516_s21 + $0x54] ss:$8 sps:$4 sm:$0xff]   ;;  %s2326_s18 = smov 124  }
  0x4c   : > { %717 = vperm.xlu0 %2131, %v2566_v2   ;;  %737 = vperm.xlu1 %2133, %v2566_v2   ;;  %v733_v43 = vrot.slane %v705_v36, %v732_v38  ;;  %v743_v44 = vrot.slane %v705_v36, %v742_v40  ;;  %s2831_s22 = sld [smem:[#allocation25_spill]]  ;;  %v805_v62 = vrot.slane %v796_v61, %v2611_v35  ;;  %v2173_v33 = vld [vmem:[%s2516_s21 + $0x50] ss:$8 sps:$4 sm:$0xff]   ;;  %v2178_v36 = vld [vmem:[%s2516_s21 + $0x44] ss:$8 sps:$4 sm:$0xff]   ;;  %vm1586_vm4 = vcmask 15360  }
  0x4d   : > { %946 = vmatpush1.bf16.msra.mxu0 %v2145_v15  ;;  %2002 = vmatpush3.bf16.msra.mxu1 %v2146_v16  ;;  %v809_v1 = vrot.slane %v796_v61, %v732_v38  ;;  %v801_v7 = vrot.slane %v796_v61, %v2609_v34  ;;  %v2181_v38 = vld [vmem:[%s2516_s21 + $0x34] ss:$8 sps:$4 sm:$0xff]   ;;  %v2184_v40 = vld [vmem:[%s2516_s21 + $0x24] ss:$8 sps:$4 sm:$0xff]   ;;  %vm1588_vm5 = vcmask 31744  }
  0x4e   : > { %947 = vmatprep.subr.bf16.mxu0 %v2147_v17  ;;  %2003 = vmatprep.subr.bf16.mxu1 %v2321_v8  ;;  %v2201_v61 = vld [vmem:[%s2532_s2 + $0x50] sm:$0xff]  }
  0x50   : > { %2134 = vset.pattern.permute.xlu0 %v2323_v13 }
  0x51   : > { %948 = vmatpush1.bf16.msra.mxu0 %v2149_v18  ;;  %2004 = vmatpush3.bf16.msra.mxu1 %v2150_v19  ;;  %s2830_s25 = scalar_lea.vmem %s2829_s16, %s2828_s24 }
  0x52   : > { %949 = vmatprep.subr.bf16.mxu0 %v2151_v20  ;;  %2005 = vmatprep.subr.bf16.mxu1 %v2321_v8  ;;  %v1876_v53 = vld [vmem:[%s2830_s25] ss:$0 sm:$0xff]  ;;  %s2832_s0 = scalar_lea.vmem %s2831_s22, %s2488_s17 }
  0x53   : > { %v1875_v55 = vld [vmem:[%s2832_s0] ss:$0 sm:$0xff]  ;;  %v761_v57 = vadd.f32 %v1876_v53, %v703_v52  ;;  %v2193_v52 = vld [vmem:[%s2532_s2 + $0x70] sm:$0xff]  }
  0x54   : > { %v2194_v53 = vld [vmem:[%s2532_s2 + $0x30] sm:$0xff]  }
  0x55   : > { %950 = vmatpush1.bf16.msra.mxu0 %v2153_v21  ;;  %2006 = vmatpush3.bf16.msra.mxu1 %v2154_v22 }
  0x56   : > { %951 = vmatprep.subr.bf16.mxu0 %v2155_v23  ;;  %2007 = vmatprep.subr.bf16.mxu1 %v2321_v8 }
  0x59   : > { %952 = vmatpush1.bf16.msra.mxu0 %v2157_v24  ;;  %2008 = vmatpush3.bf16.msra.mxu1 %v2158_v25 }
  0x5a   : > { %953 = vmatprep.subr.bf16.mxu0 %v2159_v26  ;;  %2009 = vmatprep.subr.bf16.mxu1 %v2321_v8 }
  0x5d   : > { %954 = vmatpush1.bf16.msra.mxu0 %v2161_v27  ;;  %2010 = vmatpush3.bf16.msra.mxu1 %v2162_v28  ;;  %v2167_v28 = vld [vmem:[%s2516_s21 + $0x70] ss:$8 sps:$4 sm:$0xff]  }
  0x5e   : > { %955 = vmatprep.subr.bf16.mxu0 %v2163_v29  ;;  %2011 = vmatprep.subr.bf16.mxu1 %v2321_v8  ;;  %v2169_v29 = vld [vmem:[%s2516_s21 + $0x74] ss:$8 sps:$4 sm:$0xff]  }
  0x61   : > { %956 = vmatpush1.bf16.msra.mxu0 %v2165_v30  ;;  %2012 = vmatpush3.bf16.msra.mxu1 %v2166_v31  ;;  %v2172_v30 = vld [vmem:[%s2516_s21 + $0x64] ss:$8 sps:$4 sm:$0xff]   ;;  %v2170_v31 = vld [vmem:[%s2516_s21 + $0x60] ss:$8 sps:$4 sm:$0xff]  }
  0x62   : > { %2017 = vmatprep.subr.bf16.mxu1 %v2321_v8  ;;  %1235 = vmatprep.subr.bf16.mxu0 %v2169_v29 }
  0xc2   : > { %v709_v37 = vpop.permute.xlu0 %708  ;;  %v728_v39 = vpop.permute.xlu1 %727 }
  0xc3   : > { %v715_v47 = vmul.f32 %v714_v41, %v709_v37  ;;  %v734_v49 = vmul.f32 %v733_v43, %v728_v39  ;;  %v2176_v37 = vld [vmem:[%s2516_s21 + $0x40] ss:$8 sps:$4 sm:$0xff]   ;;  %v2179_v39 = vld [vmem:[%s2516_s21 + $0x30] ss:$8 sps:$4 sm:$0xff]  }
  0xc4   : > { %v2182_v41 = vld [vmem:[%s2516_s21 + $0x20] ss:$8 sps:$4 sm:$0xff]   ;;  %v2185_v43 = vld [vmem:[%s2516_s21 + $0x10] ss:$8 sps:$4 sm:$0xff]  }
  0xc7   : > { %v718_v45 = vpop.permute.xlu0 %717  ;;  %v738_v46 = vpop.permute.xlu1 %737 }
  0xc8   : > { %v724_v48 = vmul.f32 %v723_v42, %v718_v45  ;;  %v744_v51 = vmul.f32 %v743_v44, %v738_v46  ;;  %v2187_v42 = vld [vmem:[%s2516_s21 + $0x14] ss:$8 sps:$4 sm:$0xff]  }
  0xca   : > { %v725_v50 = vadd.f32 %v724_v48, %v715_v47  ;;  %v2190_v48 = vld [vmem:[%s2516_s21 + $0x4] ss:$8 sps:$4 sm:$0xff]  }
  0xcc   : > { %v735_v54 = vadd.f32 %v734_v49, %v725_v50  ;;  %v2188_v49 = vld [vmem:[%s2516_s21] ss:$8 sps:$4 sm:$0xff]   ;;  %v2191_v50 = vld [vmem:[%s2532_s2 + $0x78] sm:$0xff]  }
  0xce   : > { %v745_v56 = vadd.f32 %v744_v51, %v735_v54  ;;  %v2192_v51 = vld [vmem:[%s2532_s2 + $0x38] sm:$0xff]   ;;  %v2195_v54 = vld [vmem:[%s2532_s2 + $0x68] sm:$0xff]  }
  0xd0   : > { %v753_v58 = vadd.f32 %v1875_v55, %v745_v56  ;;  %v2196_v55 = vld [vmem:[%s2532_s2 + $0x28] sm:$0xff]   ;;  %v2197_v56 = vld [vmem:[%s2532_s2 + $0x60] sm:$0xff]  }
  0xd2   : > { %v2626_v59 = vadd.f32 %v761_v57, %v753_v58  ;;  %v2198_v57 = vld [vmem:[%s2532_s2 + $0x20] sm:$0xff]   ;;  %v2199_v58 = vld [vmem:[%s2532_s2 + $0x58] sm:$0xff]  }
  0xd4   : > { %v763_v60 = vpack.c.bf16 %v2626_v59, %v2626_v59 }
  0xd6   : > { %974 = vmatmul.mubr.bf16.vlgmr.msra.gmra.mxu0 %v763_v60  ;;  %2014 = vmatmul.mubr.bf16.vlgmr.msra.gmra.mxu1 %v763_v60  ;;  %v2200_v60 = vld [vmem:[%s2532_s2 + $0x18] sm:$0xff]  }
  0xd7   : > { %2019 = vmatprep.mubr.msk.bf16.mxu1 %vm2324_vm1, %v2321_v8  ;;  %1267 = vmatprep.mubr.bf16.mxu0 %v2319_v3 }
  0xd8   : > { %1236 = vmatpush1.bf16.msra.mxu0 %v2167_v28  ;;  %v2212_v28 = vld [vmem:[%s2542_s19 + $0x10] sm:$0xff]  }
  0xd9   : > { %1237 = vmatprep.subr.bf16.mxu0 %v2172_v30 }
  0xdc   : > { %1238 = vmatpush1.bf16.msra.mxu0 %v2170_v31 }
  0xdd   : > { %1239 = vmatprep.subr.bf16.mxu0 %v2175_v32 }
  0xe0   : > { %1240 = vmatpush1.bf16.msra.mxu0 %v2173_v33 }
  0xe1   : > { %1241 = vmatprep.subr.bf16.mxu0 %v2178_v36 }
  0xe4   : > { %1242 = vmatpush1.bf16.msra.mxu0 %v2176_v37 }
  0xe5   : > { %1243 = vmatprep.subr.bf16.mxu0 %v2181_v38 }
  0xe8   : > { %1244 = vmatpush1.bf16.msra.mxu0 %v2179_v39  ;;  %v1935_v39 = vld [vmem:[%s2834_s7] ss:$0 sm:$0xff] }
  0xe9   : > { %1245 = vmatprep.subr.bf16.mxu0 %v2184_v40 }
  0xec   : > { %1246 = vmatpush1.bf16.msra.mxu0 %v2182_v41 }
  0xed   : > { %1247 = vmatprep.subr.bf16.mxu0 %v2187_v42 }
  0xf0   : > { %1248 = vmatpush1.bf16.msra.mxu0 %v2185_v43 }
  0xf1   : > { %1249 = vmatprep.subr.bf16.mxu0 %v2190_v48 }
  0xf4   : > { %1250 = vmatpush1.bf16.msra.mxu0 %v2188_v49 }
  0xf5   : > { %2029 = vmatprep.subr.bf16.mxu0 %v2321_v8 }
 0x196   : > { %v975_v63 = vpop.f32.mrf.mxu0  ;;  %v1016_v0 = vpop.f32.mrf.mxu1 }
 0x197   : > { %v1017_v12 = vadd.f32 %v1016_v0, %v809_v1  ;;  %v976_v15 = vadd.f32 %v975_v63, %v801_v7  ;;  %v2203_v7 = vld [vmem:[%s2532_s2 + $0x48] sm:$0xff]  }
 0x198   : > { %v977_v4 = vpop.f32.mrf.mxu0  ;;  %v2015_v5 = vpop.f32.mrf.mxu1 }
 0x199   : > { %v978_v6 = vadd.f32 %v977_v4, %v805_v62  ;;  %v1077_v3 = vpack.c.bf16 %v1017_v12, %v1017_v12  ;;  %v1022_v16 = vpack.c.bf16 %v976_v15, %v976_v15  ;;  %v2202_v62 = vld [vmem:[%s2532_s2 + $0x10] sm:$0xff]   ;;  %v2211_v15 = vld [vmem:[%s2542_s19 + $0x18] sm:$0xff]  }
 0x19a   : > { %v979_v9 = vpop.f32.mrf.mxu0  ;;  %v1019_v10 = vpop.f32.mrf.mxu1  ;;  %v2208_v12 = vld [vmem:[%s2542_s19 + $0x30] sm:$0xff]  }
 0x19b   : > { %v1023_v11 = vpack.c.bf16 %v978_v6, %v978_v6  ;;  %v1083_v17 = vsel %vm1081_vm2, %v1077_v3, 0  ;;  %v2204_v9 = vld [vmem:[%s2532_s2 + $0x8] sm:$0xff]   ;;  %v2205_v10 = vld [vmem:[%s2532_s2 + $0x40] sm:$0xff]  }
 0x19c   : > { %v980_v13 = vpop.f32.mrf.mxu0  ;;  %v2016_v14 = vpop.f32.mrf.mxu1  ;;  %v1143_v3 = vld [vmem:[%s2527_s3] sm:$0x3]  ;;  %s2325_s3 = smov 2  }
 0x19d   : > { %2018 = vmatpush3.bf16.xpose.msra.mxu1 %v1023_v11  ;;  %v2206_v11 = vld [vmem:[%s2532_s2] sm:$0xff]   ;;  %v2209_v13 = vld [vmem:[%s2542_s19 + $0x28] sm:$0xff]   ;;  %s2833_s2 = scalar_lea.vmem %s2772_s10, %s2488_s17  ;;  %s2835_s17 = sld [smem:[#allocation10_spill]] }
 0x19e   : > { %2023 = vmatprep.subr.bf16.mxu1 %v2321_v8  ;;  %v2210_v14 = vld [vmem:[%s2542_s19 + $0x20] sm:$0xff]  }
 0x19f   : > { %v1918_v30 = vld [vmem:[%s2833_s2] ss:$0 sm:$0xff] }
 0x1a3   : > { %p1944_p1 = scmp.ne.s32.totalorder %s2835_s17, 1 }
 0x1a4   : > { %2020 = vmatmul.mubr.bf16.vlgmr.msra.gmra.mxu1 %v1022_v16  ;;  %v1148_v16 = vrot.slane %v1143_v3, %v2609_v34  ;;  %v2213_v34 = vld [vmem:[%s2542_s19 + $0x8] sm:$0xff]  }
 0x1a5   : > { %2024 = vmatpush3.bf16.msra.mxu1 %v1083_v17  ;;  %2025 = vmatprep.mubr.msk.bf16.mxu1 %vm2324_vm1, %v2321_v8  ;;  %v1152_v17 = vrot.slane %v1143_v3, %v2611_v35  ;;  %v2214_v35 = vld [vmem:[%s2542_s19] sm:$0xff]  }
 0x1a6   : > { %1966 = vmatprep.subr.bf16.mxu1 %v2191_v50 }
 0x264   : > { %v1058_v18 = vpop.f32.mrf.mxu1 }
 0x265   : > { %v1065_v19 = vsel %vm1064_vm3, %v1058_v18, -inf }
 0x266   : > { %1066 = vmax.xlane.f32.xlu1 %v1065_v19  ;;  %v2021_v20 = vpop.f32.mrf.mxu1 }
 0x268   : > { %v1061_v21 = vpop.f32.mrf.mxu1 }
 0x26a   : > { %v2022_v22 = vpop.f32.mrf.mxu1 }
 0x2ef   : > { %v1067_v23 = vpop.xlane.xlu1 %1066 }
 0x2f0   : > { %v1068_v24 = vsub.f32 %v1058_v18, %v1067_v23 }
 0x2f2   : > { %v1069_v25 = vmul.f32 1.442695, %v1068_v24 }
 0x2f4   : > { %2215 = vpow2.f32 %v1069_v25 }
 0x301   : > { %v2216_v26 = vpop.eup %2215 }
 0x302   : > { %v1071_v27 = vsel %vm1064_vm3, %v2216_v26, 0.0 }
 0x303   : > { %1072 = vadd.xlane.f32.xlu0 %v1071_v27 }
 0x319   : > { %1569 = vrot.lane.b32.xlu0 %v2566_v2, %s2325_s3 }
 0x38c   : > { %v1073_v44 = vpop.xlane.xlu0 %1072 }
 0x38d   : > { %2217 = vrcp.f32 %v1073_v44 }
 0x390   : > { %v1570_v41 = vpop.permute.xlu0 %1569 }
 0x39a   : > { %v2218_v45 = vpop.eup %2217 }
 0x39b   : > { %v1075_v46 = vmul.f32 %v2218_v45, %v2216_v26 }
 0x39d   : > { %v1076_v47 = vpack.c.bf16 %v1075_v46, %v1075_v46 }
 0x39f   : > { %2026 = vmatmul.mubr.msk.bf16.vlgmr.msra.gmra.mxu1 %vm1064_vm3, %v1076_v47 }
 0x3a0   : > { %1967 = vmatpush3.bf16.msra.mxu1 %v2192_v51 }
 0x3a1   : > { %1968 = vmatprep.subr.bf16.mxu1 %v2193_v52 }
 0x3a4   : > { %1969 = vmatpush3.bf16.msra.mxu1 %v2194_v53 }
 0x3a5   : > { %1970 = vmatprep.subr.bf16.mxu1 %v2195_v54 }
 0x3a8   : > { %1971 = vmatpush3.bf16.msra.mxu1 %v2196_v55 }
 0x3a9   : > { %1972 = vmatprep.subr.bf16.mxu1 %v2197_v56 }
 0x3ac   : > { %1973 = vmatpush3.bf16.msra.mxu1 %v2198_v57 }
 0x3ad   : > { %1974 = vmatprep.subr.bf16.mxu1 %v2199_v58 }
 0x3b0   : > { %1975 = vmatpush3.bf16.msra.mxu1 %v2200_v60 }
 0x3b1   : > { %1976 = vmatprep.subr.bf16.mxu1 %v2201_v61 }
 0x3b4   : > { %1977 = vmatpush3.bf16.msra.mxu1 %v2202_v62 }
 0x3b5   : > { %1978 = vmatprep.subr.bf16.mxu1 %v2203_v7 }
 0x3b8   : > { %1979 = vmatpush3.bf16.msra.mxu1 %v2204_v9 }
 0x3b9   : > { %1980 = vmatprep.subr.bf16.mxu1 %v2205_v10 }
 0x3bc   : > { %1981 = vmatpush3.bf16.msra.mxu1 %v2206_v11 }
 0x45f   : > { %v1119_v63 = vpop.f32.mrf.mxu1 }
 0x460   : > { %v1125_v0 = vadd.f32 %v1119_v63, %v2626_v59  ;;  %v2207_v59 = vld [vmem:[%s2542_s19 + $0x38] sm:$0xff]  }
 0x461   : > { %v2027_v1 = vpop.f32.mrf.mxu1 }
 0x462   : > { %v1126_v4 = vpack.c.bf16 %v1125_v0, %v1125_v0 }
 0x463   : > { %v1122_v5 = vpop.f32.mrf.mxu1 }
 0x464   : > { %1268 = vmatmul.mubr.bf16.vlgmr.msra.gmra.mxu0 %v1126_v4 }
 0x465   : > { %v2028_v6 = vpop.f32.mrf.mxu1  ;;  %2045 = vmatprep.mubr.msk.bf16.mxu0 %vm2324_vm1, %v2321_v8  ;;  %2030 = vmatpush3.bf16.msra.mxu0 %v2207_v59 }
 0x466   : > { %2031 = vmatprep.subr.bf16.mxu0 %v2321_v8 }
 0x469   : > { %2032 = vmatpush3.bf16.msra.mxu0 %v2208_v12 }
 0x46a   : > { %2033 = vmatprep.subr.bf16.mxu0 %v2321_v8 }
 0x46d   : > { %2034 = vmatpush3.bf16.msra.mxu0 %v2209_v13 }
 0x46e   : > { %2035 = vmatprep.subr.bf16.mxu0 %v2321_v8 }
 0x471   : > { %2036 = vmatpush3.bf16.msra.mxu0 %v2210_v14 }
 0x472   : > { %2037 = vmatprep.subr.bf16.mxu0 %v2321_v8 }
 0x475   : > { %2038 = vmatpush3.bf16.msra.mxu0 %v2211_v15 }
 0x476   : > { %2039 = vmatprep.subr.bf16.mxu0 %v2321_v8 }
 0x479   : > { %2040 = vmatpush3.bf16.msra.mxu0 %v2212_v28 }
 0x47a   : > { %2041 = vmatprep.subr.bf16.mxu0 %v2321_v8 }
 0x47d   : > { %2042 = vmatpush3.bf16.msra.mxu0 %v2213_v34 }
 0x47e   : > { %2043 = vmatprep.subr.bf16.mxu0 %v2321_v8 }
 0x481   : > { %2044 = vmatpush3.bf16.msra.mxu0 %v2214_v35 }
 0x524   : > { %v1269_v18 = vpop.f32.mrf.mxu0 }
 0x525   : > { %v1270_v19 = vadd.f32 %v1269_v18, %v1148_v16 }
 0x526   : > { %v1271_v20 = vpop.f32.mrf.mxu0 }
 0x527   : > { %v1272_v21 = vadd.f32 %v1271_v20, %v1152_v17  ;;  %v1276_v22 = vmax.f32 %v1270_v19, 0.0 }
 0x528   : > { %v1273_v23 = vpop.f32.mrf.mxu0 }
 0x529   : > { %v1277_v24 = vmax.f32 %v1272_v21, 0.0  ;;  %v1278_v27 = vpack.c.bf16 %v1276_v22, %v1276_v22 }
 0x52a   : > { %v1274_v25 = vpop.f32.mrf.mxu0 }
 0x52b   : > { %v1279_v26 = vpack.c.bf16 %v1277_v24, %v1277_v24 }
 0x52d   : > { %1447 = vmatprep.mubr.bf16.mxu1 %v1279_v26 }
 0x52e   : > { %1448 = vmatmul.mubr.bf16.vlgmr.msra.gmra.mxu1 %v1278_v27 }
 0x5ee   : > { %v1982_v29 = vpop.f32.mrf.mxu1 }
 0x5f0   : > { %v1983_v31 = vpop.f32.mrf.mxu1 }
 0x5f1   : > { %v1984_v32 = vadd.f32 %v1983_v31, %v1982_v29 }
 0x5f2   : > { %v1985_v33 = vpop.f32.mrf.mxu1 }
 0x5f3   : > { %v1450_v36 = vadd.f32 %v1984_v32, %v1918_v30 }
 0x5f4   : > { %v1986_v37 = vpop.f32.mrf.mxu1 }
 0x5f5   : > { %v1455_v38 = vadd.f32 %v1450_v36, %v1125_v0 }
 0x5f7   : > { %1456 = vst [vmem:[#allocation2] sm:$0xff] %v1455_v38  ;;  %v1457_v8 = vpack.c.bf16 %v1455_v38, %v1455_v38 }
 0x5f9   : > { %2046 = vmatmul.mubr.bf16.vlgmr.msra.gmra.mxu0 %v1457_v8 }
 0x6b9   : > { %v1563_v40 = vpop.f32.mrf.mxu0 }
 0x6ba   : > { %v1564_v42 = vadd.f32 %v1935_v39, %v1563_v40 }
 0x6bb   : > { %v2047_v43 = vpop.f32.mrf.mxu0 }
 0x6bc   : > { %v1578_v44 = vmin.f32 %v1564_v42, 4.1351666  ;;  %v1572_v45 = vmul.f32 %v1570_v41, %v1564_v42 }
 0x6bd   : > { %v1566_v46 = vpop.f32.mrf.mxu0 }
 0x6be   : > { %v1579_v47 = vmul.f32 1.442695, %v1578_v44  ;;  %1574 = vrot.lane.b32.xlu1 %v1572_v45, %s2326_s18 }
 0x6bf   : > { %v2048_v48 = vpop.f32.mrf.mxu0 }
 0x6c0   : > { %2219 = vpow2.f32 %v1579_v47 }
 0x6cd   : > { %v2220_v49 = vpop.eup %2219 }
 0x6ce   : > { %1582 = vrot.lane.b32.xlu1 %v2220_v49, %s2326_s18 }
 0x730   : > { %v1575_v50 = vpop.permute.xlu1 %1574 }
 0x731   : > { %v1577_v52 = vadd.f32 %v1575_v50, %v2566_v2 }
 0x740   : > { %v1583_v51 = vpop.permute.xlu1 %1582  ;;  %1593 = sbr.rel (%p1944_p1) target bundleno = 1894 (0x766), region = 80 }
 0x741   : > { %v1585_v53 = vmul.f32 %v1583_v51, %v2566_v2 }
 0x743   : > { %v1587_v54 = vsel %vm1586_vm4, %v1577_v52, %v1585_v53 }
 0x744   : > { %1589 = vst.msk [vmem:[#allocation3] sm:$0xff] %vm1588_vm5, %v1587_v54 }
 0x745   : > { %1594 = vst [vmem:[%s628_s1] sm:$0xff] %v1564_v42  ;;  %1595 = vst.msk [vmem:[%s2551_s4] sm:$0xff] %vm1588_vm5, %v1587_v54  ;;  %v1945_v55 = vmul.f32 -1.442695, %v1564_v42 }
 0x747   : > { %2221 = vpow2.f32 %v1945_v55 }
 0x754   : > { %v2222_v56 = vpop.eup %2221 }
 0x755   : > { %v1599_v57 = vadd.f32 1.0, %v2222_v56 }
 0x757   : > { %2223 = vrcp.f32 %v1599_v57 }
 0x764   : > { %v2224_v58 = vpop.eup %2223 }
 0x765   : > { %1602 = vst [vmem:[%s2556_s26] sm:$0xff] %v2224_v58 }
 0x766 PF: > { %s2836_s6 = sld [smem:[#allocation11_spill]]  ;;  %s1625_s22 = sshll.u32 %s628_s1, 4  ;;  %s1626_s22 = int_to_ptr.vmem [resolvable:$true] %s1625_s22 }
 0x767   : > { %s2837_s20 = sld [smem:[#allocation8_spill]]  ;;  %s2225_s3 = scalar_lea.vmem %s1626_s22, 128 }
 0x768   : > { %s2839_s25 = sld [smem:[#allocation29_spill]]  ;;  %p2226_p2 = scmp.ne.s32.totalorder %s1626_s22, %s2225_s3 }
 0x769   : > { %s2327_s26 = smov [#allocation4]  }
 0x76a   : > { %p2227_p4 = pnand %p2226_p2, %p2457_p3  ;;  %s2229_s21 = sshll.u32 %s2327_s26, 4  ;;  %s2230_s21 = int_to_ptr.vmem [resolvable:$false] %s2229_s21 }
 0x76b   : > { %s2231_s13 = scalar_lea.vmem %s2230_s21, 256  ;;  %p2232_p6 = scmp.lt.s32.totalorder %s1626_s22, %s2230_s21 }
 0x76c   : > { %s1947_s27 = sshll.u32 %s2836_s6, 7  ;;  %p2228_p5 = pneg %p2227_p4 }
 0x76d   : > { %s2841_s4 = sand.u32 1, %s2837_s20   ;;  %p2233_p7 = scmp.lt.s32.totalorder %s2231_s13, %s2225_s3 }
 0x76e   : > { %s2840_s28 = smov %s2839_s25  ;;  %s1623_s30 = scalar_lea.hbm %s2839_s25, %s1947_s27 }
 0x76f   : > { %s1604_s0 = scalar_lea.sflag [#allocation5], %s2841_s4  ;;  %p2234_p8 = por %p2233_p7, %p2232_p6 }
 0x771   : > { %p2235_p10 = pnand %p2234_p8, %p2228_p5 }
 0x773   : > { %2238 = shalt.err (!%p2235_p10)
}
 0x774   : > { %s2239_s2 = scalar_lea.hbm %s1623_s30, 128  ;;  %s2243_s19 = scalar_lea.hbm %s2840_s28, 256 }
 0x775   : > { %p2240_p11 = scmp.ne.s32.totalorder %s1623_s30, %s2239_s2  ;;  %p2244_p0 = scmp.lt.s32.totalorder %s1623_s30, %s2840_s28 }
 0x776   : > { %p2245_p1 = scmp.lt.s32.totalorder %s2243_s19, %s2239_s2 }
 0x777   : > { %p2241_p12 = pnand %p2240_p11, %p2457_p3 }
 0x778   : > { %p2246_p2 = por %p2245_p1, %p2244_p0 }
 0x779   : > { %p2242_p13 = pneg %p2241_p12 }
 0x77b   : > { %p2247_p4 = pnand %p2246_p2, %p2242_p13 }
 0x77d   : > { %2250 = shalt.err (!%p2247_p4)
}
 0x77e   : > { %2051 = dma.vmem_to_hbm [thread:$0]  (%p2457_p3), %s1626_s22, 128, %s1623_s30, %s1604_s0  }
 0x77f PF: > { %s2842_s18 = sld [smem:[#allocation14_spill]] }
 0x780   : > { %s2843_s17 = sld [smem:[#allocation7_spill]] }
 0x785   : > { %p2057_p5 = scmp.ge.s32.totalorder %s2842_s18, 2 }
 0x786   : > { %s1643_s20 = sand.u32 1, %s2843_s17  }
 0x787   : > { %p2054_p6 = pnand %p2057_p5, %p2467_p9  ;;  %s1644_s27 = scalar_lea.sflag [#allocation5], %s1643_s20 }
 0x789   : > { %p2055_p7 = pneg %p2054_p6 }
 0x78b   : > { %2284 = dma.done.wait (%p2055_p7), %s1644_s27, 128  }
 0x78c   : > { %2286 = vsyncadd (%p2055_p7), %s1644_s27, 4294967168  ;;  %s29_s25 = sadd.s32 1, %s2842_s18   ;;  %s2845_s18 = sld [smem:[#allocation8_spill]] }
 0x78d   : > { %p26_p8 = scmp.ge.s32.totalorder %s29_s25, 6   ;;  %s2846_s19 = sld [smem:[#allocation9_spill]] }
 0x78e   : > { %s2847_s20 = sld [smem:[#allocation19_spill]] }
 0x78f   : > { %s2848_s21 = sld [smem:[#allocation12_spill]]  ;;  %28 = sbr.rel (!%p26_p8) target bundleno = 15 (0xf), region = 169 }
 0x790   : > { %s2849_s22 = sld [smem:[#allocation13_spill]] }
 0x791   : > { %s2850_s23 = sld [smem:[#allocation15_spill]] }
 0x792   : > { %s2851_s24 = sld [smem:[#allocation17_spill]] }
 0x794   :  { %1663 = vsyncpa [#allocation5], 1 }
 0x795   :  { %1665 = vsyncpa [#allocation5 + $0x1], 1 }

</bundles_post_ra>
